<compile_context>
chip_gen: v7x
topology: tpu7x:2x2x1
jax: 0.10.0
libtpu: 0.0.40
codegen_flags: <defaults>
</compile_context>

<pallas_src>
import math

import jax
import jax.numpy as jnp
from jax import lax
from jax.experimental import pallas as pl
from jax.experimental.pallas import tpu as pltpu


def _pick_tile_rows(H_out, W_out, target_m=256):
    """Output-row tile TH.

    M_tile = TH * W_out is the matmul M dimension and the lane axis of the output slab.
    Aim for M_tile ~ target_m (fills the 256-wide v6e/v7x MXU better and amortizes the
    ~0.35us/step overhead), collapse the H tiling for small images, and — when the extra
    padded rows stay cheap — round TH up so M_tile is a multiple of 128 (unmasked stores).
    No divisor requirement on H_out: ragged tiles are absorbed by bottom padding.
    """
    th = max(1, math.ceil(target_m / W_out))
    th = min(th, H_out)
    unit = 128 // math.gcd(W_out, 128)             # smallest TH step with M_tile % 128 == 0
    th_aligned = math.ceil(th / unit) * unit
    padded_rows = math.ceil(H_out / th_aligned) * th_aligned
    if padded_rows <= H_out + max(8, H_out // 4):  # only if the padding overhead is modest
        th = th_aligned
    return th


def _vmem_budget_bytes(block_bytes):
    """Scoped-VMEM budget from the actual resident set (review: don't hard-code 32 MiB)."""
    resident = 2 * sum(block_bytes)                # the pipeline double-buffers every block
    budget = max(resident + max(resident, 8 << 20), 16 << 20)  # + headroom for im2col temps
    try:
        cap = int(pltpu.get_tpu_info().vmem_capacity_bytes)    # 64 MiB v7x, 128 MiB v5e/v6e
    except Exception:
        cap = 64 << 20
    return int(min(budget, max(cap - (8 << 20), resident + (4 << 20))))


def _make_cdilated_kernel(kH, kW, d, stride, TH, W_out):
    M = TH * W_out

    def kernel(x_ref, w_ref, o_ref):
        # x_ref: (Hp, Wp, Cin)   -- one padded batch element (batch dim squeezed)
        # w_ref: (Cout_pad, KK)  -- (ky,kx,ci)-flattened weights, Cout padded to sublanes
        # o_ref: (Cout_pad, M)   -- transposed, lane-dense output slab for this row tile
        i = pl.program_id(1)
        h_base = pl.multiple_of(i * (TH * stride), TH * stride)

        # im2col gather: ONE slab load per ky; the kW taps are in-register slices of it.
        taps = []
        for ky in range(kH):
            row0 = h_base + ky * d
            if stride == 1:
                slab = x_ref[pl.ds(row0, TH), :, :]              # (TH, Wp, Cin)
            else:
                slab = x_ref[pl.ds(row0, TH, stride), :, :]
            for kx in range(kW):
                c0 = kx * d
                if stride == 1:
                    taps.append(slab[:, c0:c0 + W_out, :])
                else:
                    taps.append(slab[:, c0:c0 + (W_out - 1) * stride + 1:stride, :])
        col = jnp.concatenate(taps, axis=-1)                     # (TH, W_out, KK)
        col2d = col.reshape(M, -1)                               # minor dim kept -> cheap

        # One MXU contraction per step: (Cout_pad, KK) x (M, KK) contracting KK of both
        # operands -> (Cout_pad, M).  Sublanes = Cout_pad (multiple of 8), lanes = M
        # (multiple of 128) -> full, unmasked stores and ~16x less output HBM traffic than
        # the old (M, 128-padded-Cout) layout.  f32 accumulation via preferred type only.
        acc = lax.dot_general(
            w_ref[...], col2d,
            dimension_numbers=(((1,), (1,)), ((), ())),
            preferred_element_type=jnp.float32,
        )
        o_ref[...] = acc.astype(o_ref.dtype)

    return kernel


def cdilated_forward(x_nchw, weight_oihw, kSize, stride=1, d=1, compute_dtype=None):
    """Forward pass of CDilated (nn.Conv2d, bias=False, dilation=d).  NCHW in / NCHW out.

    compute_dtype: optional operand dtype for the kernel (e.g. jnp.bfloat16 on v5e, where
    the MXU is bf16-native and it halves VMEM/DMA bytes); accumulation stays f32.
    """
    N, Cin, H, W = x_nchw.shape
    Cout = weight_oihw.shape[0]
    kH = kW = kSize
    padding = int((kSize - 1) / 2) * d

    H_out = (H + 2 * padding - d * (kH - 1) - 1) // stride + 1
    W_out = (W + 2 * padding - d * (kW - 1) - 1) // stride + 1

    out_dtype = x_nchw.dtype
    cdt = jnp.dtype(compute_dtype) if compute_dtype is not None else jnp.dtype(out_dtype)

    # ---- tiling (no divisor requirement on H_out; ragged last tile is padded) ----
    TH = _pick_tile_rows(H_out, W_out)
    H_tiles = math.ceil(H_out / TH)
    H_out_pad = H_tiles * TH
    M_tile = TH * W_out

    # ---- wrapper glue: layout conversion, spatial padding, weight flattening ----
    x_nhwc = jnp.transpose(x_nchw, (0, 2, 3, 1)).astype(cdt)      # (N, H, W, Cin)
    Hp0, Wp = H + 2 * padding, W + 2 * padding
    # Extra bottom rows so padded output rows (ragged last tile) read valid zeros.
    Hp = max(Hp0, (H_out_pad - 1) * stride + (kH - 1) * d + 1)
    x_pad = jnp.pad(
        x_nhwc, ((0, 0), (padding, padding + (Hp - Hp0)), (padding, padding), (0, 0)))

    # OIHW -> (Cout, kH*kW*Cin) in (ky, kx, ci) order; pad Cout only to the sublane
    # multiple (8 for f32) instead of 128 -> ~16x less padded output to write back.
    KK = kH * kW * Cin
    sub = {4: 8, 2: 16, 1: 32}.get(jnp.dtype(cdt).itemsize, 8)
    Cout_pad = math.ceil(Cout / sub) * sub
    w2 = jnp.transpose(weight_oihw, (0, 2, 3, 1)).reshape(Cout, KK).astype(cdt)
    w2 = jnp.pad(w2, ((0, Cout_pad - Cout), (0, 0)))

    kernel = _make_cdilated_kernel(kH, kW, d, stride, TH, W_out)

    vmem_bytes = _vmem_budget_bytes([
        Hp * Wp * Cin * jnp.dtype(cdt).itemsize,             # x block (whole padded image)
        Cout_pad * KK * jnp.dtype(cdt).itemsize,             # weight block
        Cout_pad * M_tile * jnp.dtype(out_dtype).itemsize,   # output block
    ])

    out_flat = pl.pallas_call(
        kernel,
        out_shape=jax.ShapeDtypeStruct((N, H_tiles, Cout_pad, M_tile), out_dtype),
        grid_spec=pltpu.PrefetchScalarGridSpec(
            num_scalar_prefetch=0,
            grid=(N, H_tiles),
            in_specs=[
                # Whole padded image for batch n; only re-fetched when n changes.
                pl.BlockSpec((None, Hp, Wp, Cin), lambda n, i: (n, 0, 0, 0)),
                # Flattened weights, resident for the whole grid (tiny: Cout_pad*KK).
                pl.BlockSpec((Cout_pad, KK), lambda n, i: (0, 0)),
            ],
            out_specs=pl.BlockSpec((None, None, Cout_pad, M_tile),
                                   lambda n, i: (n, i, 0, 0)),
        ),
        compiler_params=pltpu.CompilerParams(
            dimension_semantics=("parallel", "parallel"),
            vmem_limit_bytes=vmem_bytes,
        ),
    )(x_pad, w2)

    # (N, H_tiles, Cout_pad, TH*W_out) is already channel-major: reshape / slice only.
    if H_tiles == 1:
        out = out_flat.reshape(N, Cout_pad, TH, W_out)
    else:
        out = jnp.moveaxis(out_flat.reshape(N, H_tiles, Cout_pad, TH, W_out), 2, 1)
        out = out.reshape(N, Cout_pad, H_out_pad, W_out)
    return out[:, :Cout, :H_out, :]


if __name__ == "__main__":
    # CDilated(nIn=4, nOut=8, kSize=3, stride=1, d=2)
    nIn, nOut, kSize, stride, d = 4, 8, 3, 1, 2
    N, H, W = 2, 16, 16

    key = jax.random.PRNGKey(0)
    kx_, kw_ = jax.random.split(key)
    x = jax.random.normal(kx_, (N, nIn, H, W), dtype=jnp.float32)
    weight = 0.1 * jax.random.normal(kw_, (nOut, nIn, kSize, kSize), dtype=jnp.float32)

    out = cdilated_forward(x, weight, kSize, stride=stride, d=d)
    out = jax.block_until_ready(out)

    # Cross-check against XLA's dilated conv (same semantics as nn.Conv2d, bias=False).
    padding = int((kSize - 1) / 2) * d
    ref = jax.lax.conv_general_dilated(
        x, weight,
        window_strides=(stride, stride),
        padding=((padding, padding), (padding, padding)),
        rhs_dilation=(d, d),
        dimension_numbers=("NCHW", "OIHW", "NCHW"),
    )
    assert out.shape == ref.shape, (out.shape, ref.shape)
    assert jnp.allclose(out, ref, atol=1e-4, rtol=1e-4), float(jnp.max(jnp.abs(out - ref)))

    print("KERNEL_OK")
</pallas_src>

<mosaic_0001>
module attributes {stable_mosaic.version = 11 : i64} {
  func.func @kernel(%arg0: i32, %arg1: i32, %arg2: memref<1x20x20x4xf32, #tpu.memory_space<vmem>>, %arg3: memref<8x36xf32, #tpu.memory_space<vmem>>, %arg4: memref<1x1x8x256xf32, #tpu.memory_space<vmem>>) attributes {dimension_semantics = [#tpu.dimension_semantics<parallel>, #tpu.dimension_semantics<parallel>], iteration_bounds = array<i64: 2, 1>, scalar_prefetch = 0 : i64, scratch_operands = 0 : i64, tpu.core_type = #tpu.core_type<tc>, window_params = [{transform_indices = @transform_0, window_bounds = array<i64: 1, 20, 20, 4>}, {pipeline_mode = #tpu.pipeline_mode<synchronous>, transform_indices = @transform_1, window_bounds = array<i64: 8, 36>}, {transform_indices = @transform_2, window_bounds = array<i64: 1, 1, 8, 256>}]} {
    %c16_i32 = arith.constant 16 : i32
    %0 = arith.muli %arg1, %c16_i32 : i32
    %1 = tpu.assume_multiple %0, 16 : i32
    %c0_i32 = arith.constant 0 : i32
    %2 = arith.addi %1, %c0_i32 : i32
    %c0 = arith.constant 0 : index
    %3 = arith.index_cast %2 : i32 to index
    %c0_0 = arith.constant 0 : index
    %c0_1 = arith.constant 0 : index
    %4 = vector.load %arg2[%c0, %3, %c0_0, %c0_1] : memref<1x20x20x4xf32, #tpu.memory_space<vmem>>, vector<1x16x20x4xf32>
    %5 = vector.shape_cast %4 : vector<1x16x20x4xf32> to vector<16x20x4xf32>
    %6 = vector.extract_strided_slice %5 {offsets = [0, 0, 0], sizes = [16, 16, 4], strides = [1, 1, 1]} : vector<16x20x4xf32> to vector<16x16x4xf32>
    %7 = vector.extract_strided_slice %5 {offsets = [0, 2, 0], sizes = [16, 16, 4], strides = [1, 1, 1]} : vector<16x20x4xf32> to vector<16x16x4xf32>
    %8 = vector.extract_strided_slice %5 {offsets = [0, 4, 0], sizes = [16, 16, 4], strides = [1, 1, 1]} : vector<16x20x4xf32> to vector<16x16x4xf32>
    %c2_i32 = arith.constant 2 : i32
    %9 = arith.addi %1, %c2_i32 : i32
    %c0_2 = arith.constant 0 : index
    %10 = arith.index_cast %9 : i32 to index
    %c0_3 = arith.constant 0 : index
    %c0_4 = arith.constant 0 : index
    %11 = vector.load %arg2[%c0_2, %10, %c0_3, %c0_4] : memref<1x20x20x4xf32, #tpu.memory_space<vmem>>, vector<1x16x20x4xf32>
    %12 = vector.shape_cast %11 : vector<1x16x20x4xf32> to vector<16x20x4xf32>
    %13 = vector.extract_strided_slice %12 {offsets = [0, 0, 0], sizes = [16, 16, 4], strides = [1, 1, 1]} : vector<16x20x4xf32> to vector<16x16x4xf32>
    %14 = vector.extract_strided_slice %12 {offsets = [0, 2, 0], sizes = [16, 16, 4], strides = [1, 1, 1]} : vector<16x20x4xf32> to vector<16x16x4xf32>
    %15 = vector.extract_strided_slice %12 {offsets = [0, 4, 0], sizes = [16, 16, 4], strides = [1, 1, 1]} : vector<16x20x4xf32> to vector<16x16x4xf32>
    %c4_i32 = arith.constant 4 : i32
    %16 = arith.addi %1, %c4_i32 : i32
    %c0_5 = arith.constant 0 : index
    %17 = arith.index_cast %16 : i32 to index
    %c0_6 = arith.constant 0 : index
    %c0_7 = arith.constant 0 : index
    %18 = vector.load %arg2[%c0_5, %17, %c0_6, %c0_7] : memref<1x20x20x4xf32, #tpu.memory_space<vmem>>, vector<1x16x20x4xf32>
    %19 = vector.shape_cast %18 : vector<1x16x20x4xf32> to vector<16x20x4xf32>
    %20 = vector.extract_strided_slice %19 {offsets = [0, 0, 0], sizes = [16, 16, 4], strides = [1, 1, 1]} : vector<16x20x4xf32> to vector<16x16x4xf32>
    %21 = vector.extract_strided_slice %19 {offsets = [0, 2, 0], sizes = [16, 16, 4], strides = [1, 1, 1]} : vector<16x20x4xf32> to vector<16x16x4xf32>
    %22 = vector.extract_strided_slice %19 {offsets = [0, 4, 0], sizes = [16, 16, 4], strides = [1, 1, 1]} : vector<16x20x4xf32> to vector<16x16x4xf32>
    %23 = tpu.concatenate %6, %7, %8, %13, %14, %15, %20, %21, %22 in 2 : vector<16x16x4xf32>, vector<16x16x4xf32>, vector<16x16x4xf32>, vector<16x16x4xf32>, vector<16x16x4xf32>, vector<16x16x4xf32>, vector<16x16x4xf32>, vector<16x16x4xf32>, vector<16x16x4xf32> -> vector<16x16x36xf32>
    %24 = vector.shape_cast %23 : vector<16x16x36xf32> to vector<256x36xf32>
    %c0_8 = arith.constant 0 : index
    %c0_9 = arith.constant 0 : index
    %25 = vector.load %arg3[%c0_8, %c0_9] : memref<8x36xf32, #tpu.memory_space<vmem>>, vector<8x36xf32>
    %cst = arith.constant dense<0.000000e+00> : vector<8x256xf32>
    %26 = tpu.matmul %25, %24, %cst {dimension_numbers = #tpu.dot_dimension_numbers<[1], [1], [0], [0], [0, 0, 1, 0], [], []>} : vector<8x36xf32>, vector<256x36xf32>, vector<8x256xf32> -> vector<8x256xf32>
    %c0_10 = arith.constant 0 : index
    %c0_11 = arith.constant 0 : index
    %c0_12 = arith.constant 0 : index
    %c0_13 = arith.constant 0 : index
    %27 = vector.load %arg4[%c0_10, %c0_11, %c0_12, %c0_13] : memref<1x1x8x256xf32, #tpu.memory_space<vmem>>, vector<1x1x8x256xf32>
    %28 = vector.shape_cast %27 : vector<1x1x8x256xf32> to vector<8x256xf32>
    %29 = vector.shape_cast %26 : vector<8x256xf32> to vector<1x1x8x256xf32>
    tpu.vector_store %arg4[%c0_10, %c0_11, %c0_12, %c0_13], %29 {strides = array<i32>} : memref<1x1x8x256xf32, #tpu.memory_space<vmem>>, vector<1x1x8x256xf32>,
    return
  }
  func.func @transform_0(%arg0: i32, %arg1: i32) -> (i32, i32, i32, i32) {
    %c0_i32 = arith.constant 0 : i32
    %c0_i32_0 = arith.constant 0 : i32
    %c0_i32_1 = arith.constant 0 : i32
    %c0_i32_2 = arith.constant 0 : i32
    return %arg0, %c0_i32, %c0_i32_0, %c0_i32_1 : i32, i32, i32, i32
  }
  func.func @transform_1(%arg0: i32, %arg1: i32) -> (i32, i32) {
    %c0_i32 = arith.constant 0 : i32
    %c0_i32_0 = arith.constant 0 : i32
    %c0_i32_1 = arith.constant 0 : i32
    return %c0_i32, %c0_i32_0 : i32, i32
  }
  func.func @transform_2(%arg0: i32, %arg1: i32) -> (i32, i32, i32, i32) {
    %c0_i32 = arith.constant 0 : i32
    %c0_i32_0 = arith.constant 0 : i32
    %c0_i32_1 = arith.constant 0 : i32
    return %arg0, %arg1, %c0_i32, %c0_i32_0 : i32, i32, i32, i32
  }
}

</mosaic_0001>

<bundles_post_ra>
// kernel: tpu_custom_call.1
= control target key start
LH: loop header
LB: loop body
LE: loop exit
PB: predicated region body
PF: predicated region fallthrough
CT: control target
= control target key end

     0   :  { %7 = vsyncpa [#allocation3], 0  ;;  %s5429_s0 = inlined_call_operand.vmem [shape: f32[2,20,20,4], index: 0, kind: input, shape index: {}]   ;;  %s5430_s1 = inlined_call_operand.vmem [shape: f32[8,36], index: 1, kind: input, shape index: {}]   ;;  %s5431_s2 = inlined_call_operand.hbm [shape: f32[2,1,8,256], index: 2, kind: output, shape index: {}]  }
   0x1   :  { %9 = vsyncpa [#allocation3 + $0x1], 0  ;;  %s3302_s9 = smov 0   ;;  %s3304_s10 = smov 0  }
   0x2   :  { %s3306_s11 = smov 0   ;;  %s3308_s12 = smov 0  }
   0x3   :  { %s3310_s13 = smov 0   ;;  %s3312_s14 = smov 0  }
   0x4 LB: > { %s2238_s15 = sadd.s32 4294967295, %s3276_s14   ;;  %s2239_s16 = sadd.s32 4294967294, %s3276_s14   ;;  %s3276_s14 = sphi %s3312_s14, %s15_s14   ;;  %s3272_s13 = sphi %s3310_s13, %s5717_s13   ;;  %s3268_s12 = sphi %s3308_s12, %s5716_s12   ;;  %s3264_s11 = sphi %s3306_s11, %s5715_s11   ;;  %s3260_s10 = sphi %s3304_s10, %s5714_s10   ;;  %s3256_s9 = sphi %s3302_s9, %s5713_s9  }
   0x5   : > { %s27_s17 = sadd.s32 1, %s3272_s13  ;;  %s83_s18 = sadd.s32 1, %s3264_s11 }
   0x6   : > { %p29_p0 = scmp.ge.s32.totalorder %s27_s17, 2  ;;  %p93_p1 = scmp.ne.s32.totalorder %s3264_s11, %s3260_s10 }
   0x7   : > { %p94_p2 = scmp.eq.s32.totalorder %s2238_s15, 1  ;;  %p99_p3 = scmp.ne.s32.totalorder %s3260_s10, %s3256_s9 }
   0x8   : > { %s5719_s17 = smov (%p29_p0, %s27_s17), 0  ;;  %p100_p5 = scmp.eq.s32.totalorder %s2239_s16, 1 }
   0x9   : > { %p3342_p4 = por %p94_p2, %p93_p1  ;;  %s78_s20 = ssub.s32 %s3272_s13, %s5719_s17 }
   0xa   : > { %p2242_p6 = scmp.ge.s32.totalorder %s3276_s14, 1  ;;  %p81_p7 = scmp.eq.s32.totalorder %s78_s20, 0 }
   0xb   : > { %p3349_p8 = por %p100_p5, %p99_p3  ;;  %p129_p9 = scmp.lt.s32.totalorder %s3276_s14, 3 }
   0xc   : > { %s3355_s22 = scalar_select %p81_p7, %s3264_s11, %s83_s18  }
   0xd   : > { %p130_p10 = pnand %p2242_p6, %p129_p9 }
   0xf   : > { %133 = sbr.rel (%p130_p10) target bundleno = 648 (0x288), region = 28 }
  0x16   : > { %p151_p11 = scmp.lt.s32.totalorder %s3268_s12, 1  ;;  %vm357_vm0 = vcmask 1045504   ;;  %s3278_s28 = smov 4   ;;  %vm534_vm1 = vcmask 1043456   ;;  %vm1703_vm2 = vcmask 31744   ;;  %vm1736_vm3 = vcmask 64512  }
  0x17   : > { %s3279_s29 = smov 8   ;;  %s3280_s30 = smov 12   ;;  %vm1769_vm4 = vcmask 97280   ;;  %vm1802_vm5 = vcmask 130048   ;;  %vm1835_vm6 = vcmask 162816   ;;  %vm1868_vm7 = vcmask 195584  }
  0x18   : > { %s152_s23 = scalar_select %p151_p11, %s3268_s12, 1  ;;  %vm1901_vm8 = vcmask 228352   ;;  %vm1934_vm9 = vcmask 261120   ;;  %vm1968_vm10 = vcmask 293888  }
  0x19   : > { %s3281_s3 = smov 16   ;;  %s3282_s4 = smov 20   ;;  %vm4941_vm11 = vmpackc.low %vm1968_vm10, %vm1968_vm10 }
  0x1a   : > { %s2462_s24 = smul.u32 480, %s152_s23  ;;  %s3283_s5 = smov 24  }
  0x1b   : > { %s3284_s6 = smov 28   ;;  %s3285_s7 = smov 32  }
  0x1c   : > { %s3362_s27 = scalar_lea.vmem %s5429_s0, %s2462_s24  ;;  %s148_s16 = sand.u32 1, %s3260_s10  }
  0x1d   : > { %v3365_v0 = vld [vmem:[%s3362_s27 + $0x30] sm:$0xff]  ;;  %v3368_v1 = vld [vmem:[%s3362_s27 + $0x38] sm:$0xff]  ;;  %v3371_v2 = vld [vmem:[%s3362_s27 + $0x40] sm:$0xf]  ;;  %s2243_s18 = sshll.u32 %s148_s16, 4  ;;  %s2379_s24 = sshll.u32 %s3268_s12, 8 }
  0x1e   : > { %v368_v3 = vrot.slane %v3365_v0, 2  ;;  %v3375_v4 = vrot.slane %v3368_v1, 2  ;;  %v371_v5 = vrot.slane %v3371_v2, 2  ;;  %v3379_v6 = vld [vmem:[%s3362_s27] sm:$0xff]  ;;  %v3382_v7 = vld [vmem:[%s3362_s27 + $0x8] sm:$0xff]  ;;  %v3393_v12 = vld [vmem:[%s3362_s27 + $0x50] sm:$0xff] }
  0x1f   : > { %v3385_v8 = vld [vmem:[%s3362_s27 + $0x10] sm:$0xf]  ;;  %v358_v9 = vrot.slane %v3379_v6, 2  ;;  %v359_v10 = vrot.slane %v3382_v7, 2  ;;  %v3390_v11 = vld [vmem:[%s3362_s27 + $0x48] sm:$0xff]  ;;  %v3406_v17 = vld [vmem:[%s3362_s27 + $0x18] sm:$0xff] }
  0x20   : > { %5510 = vst [vmem:[#allocation5_spill] sm:$0xff] %v3375_v4  ;;  %v3397_v13 = vsel %vm357_vm0, %v368_v3, %v3375_v4  ;;  %v372_v14 = vsel %vm357_vm0, %v3375_v4, %v371_v5  ;;  %v361_v15 = vrot.slane %v3385_v8, 2  ;;  %v3403_v16 = vld [vmem:[%s3362_s27 + $0x58] sm:$0xf]  ;;  %v3409_v18 = vld [vmem:[%s3362_s27 + $0x20] sm:$0xff]  ;;  %v373_v21 = vrot.slane %v3390_v11, 2 }
  0x21   : > { %5511 = vst [vmem:[#allocation6_spill] sm:$0xff] %v3397_v13  ;;  %v2536_v19 = vpack.i.bf16 %v372_v14, %v3397_v13  ;;  %v360_v20 = vsel %vm357_vm0, %v358_v9, %v359_v10  ;;  %v3415_v22 = vrot.slane %v3393_v12, 2  ;;  %v3418_v23 = vld [vmem:[%s3362_s27 + $0x28] sm:$0xf]  ;;  %v3421_v24 = vld [vmem:[%s3362_s27 + $0x78] sm:$0xff]  ;;  %v3424_v25 = vld [vmem:[%s3362_s27 + $0x80] sm:$0xff] }
  0x22   : > { %v362_v26 = vsel %vm357_vm0, %v359_v10, %v361_v15  ;;  %v376_v27 = vrot.slane %v3403_v16, 2  ;;  %v363_v28 = vrot.slane %v3406_v17, 2  ;;  %v364_v29 = vrot.slane %v3409_v18, 2  ;;  %v3431_v30 = vld [vmem:[%s3362_s27 + $0x88] sm:$0xf]  ;;  %v3434_v31 = vld [vmem:[%s3362_s27 + $0x60] sm:$0xff] }
  0x23   : > { %5512 = vst [vmem:[#allocation7_spill] sm:$0xff] %v3415_v22  ;;  %2537 = vrot.lane.b32.xlu1 %v2536_v19, %s3278_s28  ;;  %v2526_v32 = vpack.i.bf16 %v362_v26, %v360_v20  ;;  %v3439_v33 = vsel %vm357_vm0, %v373_v21, %v3415_v22  ;;  %v366_v34 = vrot.slane %v3418_v23, 2  ;;  %v383_v35 = vrot.slane %v3421_v24, 2  ;;  %v3444_v36 = vld [vmem:[%s3362_s27 + $0x68] sm:$0xff]  ;;  %v3447_v37 = vld [vmem:[%s3362_s27 + $0x70] sm:$0xf] }
  0x24   : > { %5513 = vst [vmem:[#allocation8_spill] sm:$0xff] %v3439_v33  ;;  %v377_v38 = vsel %vm357_vm0, %v3415_v22, %v376_v27  ;;  %v365_v39 = vsel %vm357_vm0, %v363_v28, %v364_v29  ;;  %v3453_v40 = vrot.slane %v3424_v25, 2  ;;  %v386_v41 = vrot.slane %v3431_v30, 2  ;;  %v3457_v42 = vld [vmem:[%s3362_s27 + $0xa8] sm:$0xff]  ;;  %v3460_v43 = vld [vmem:[%s3362_s27 + $0xb0] sm:$0xff]  ;;  %v3476_v50 = vld [vmem:[%s3362_s27 + $0x98] sm:$0xff] }
  0x25   : > { %2527 = vrot.lane.b32.xlu0 %v2526_v32, %s3278_s28  ;;  %v2541_v44 = vpack.i.bf16 %v377_v38, %v3439_v33  ;;  %v367_v45 = vsel %vm357_vm0, %v364_v29, %v366_v34  ;;  %v378_v46 = vrot.slane %v3434_v31, 2  ;;  %v3467_v47 = vrot.slane %v3444_v36, 2  ;;  %v3470_v48 = vld [vmem:[%s3362_s27 + $0xb8] sm:$0xf]  ;;  %v3473_v49 = vld [vmem:[%s3362_s27 + $0x90] sm:$0xff]  ;;  %v3502_v61 = vld [vmem:[%s3362_s27 + $0xe0] sm:$0xff] }
  0x26   : > { %5514 = vst [vmem:[#allocation9_spill] sm:$0xff] %v3453_v40  ;;  %v2531_v51 = vpack.i.bf16 %v367_v45, %v365_v39  ;;  %v3480_v52 = vsel %vm357_vm0, %v383_v35, %v3453_v40  ;;  %v387_v53 = vsel %vm357_vm0, %v3453_v40, %v386_v41  ;;  %v381_v54 = vrot.slane %v3447_v37, 2  ;;  %v3486_v55 = vld [vmem:[%s3362_s27 + $0xa0] sm:$0xf]  ;;  %v3489_v56 = vld [vmem:[%s3362_s27 + $0xd8] sm:$0xff]  ;;  %v3518_v14 = vld [vmem:[%s3362_s27 + $0xc8] sm:$0xff] }
  0x27   : > { %5515 = vst [vmem:[#allocation10_spill] sm:$0xff] %v3467_v47  ;;  %5516 = vst [vmem:[#allocation11_spill] sm:$0xff] %v3480_v52  ;;  %2542 = vrot.lane.b32.xlu1 %v2541_v44, %s3278_s28  ;;  %v2551_v57 = vpack.i.bf16 %v387_v53, %v3480_v52  ;;  %v3495_v58 = vsel %vm357_vm0, %v378_v46, %v3467_v47  ;;  %v393_v59 = vrot.slane %v3457_v42, 2  ;;  %v3499_v60 = vrot.slane %v3460_v43, 2  ;;  %v3505_v62 = vld [vmem:[%s3362_s27 + $0xe8] sm:$0xf] }
  0x28   : > { %5517 = vst [vmem:[#allocation12_spill] sm:$0xff] %v3495_v58  ;;  %v382_v63 = vsel %vm357_vm0, %v3467_v47, %v381_v54  ;;  %v396_v3 = vrot.slane %v3470_v48, 2  ;;  %v388_v5 = vrot.slane %v3473_v49, 2  ;;  %v3512_v9 = vrot.slane %v3476_v50, 2  ;;  %v3515_v10 = vld [vmem:[%s3362_s27 + $0xc0] sm:$0xff]  ;;  %v3542_v34 = vld [vmem:[%s3362_s27 + $0x108] sm:$0xff] }
  0x29   : > { %5518 = vst [vmem:[#allocation13_spill] sm:$0xff] %v3499_v60  ;;  %2532 = vrot.lane.b32.xlu0 %v2531_v51, %s3278_s28  ;;  %v2546_v15 = vpack.i.bf16 %v382_v63, %v3495_v58  ;;  %v3524_v19 = vsel %vm357_vm0, %v393_v59, %v3499_v60  ;;  %v391_v20 = vrot.slane %v3486_v55, 2  ;;  %v403_v21 = vrot.slane %v3489_v56, 2  ;;  %v3529_v26 = vld [vmem:[%s3362_s27 + $0xd0] sm:$0xf]  ;;  %v3562_v51 = vld [vmem:[%s3362_s27 + $0xf8] sm:$0xff] }
  0x2a   : > { %5519 = vst [vmem:[#allocation14_spill] sm:$0xff] %v3512_v9  ;;  %5520 = vst [vmem:[#allocation15_spill] sm:$0xff] %v3524_v19  ;;  %v397_v27 = vsel %vm357_vm0, %v3499_v60, %v396_v3  ;;  %v3535_v28 = vsel %vm357_vm0, %v388_v5, %v3512_v9  ;;  %v3538_v29 = vrot.slane %v3502_v61, 2  ;;  %v406_v32 = vrot.slane %v3505_v62, 2  ;;  %v3545_v35 = vld [vmem:[%s3362_s27 + $0x110] sm:$0xff]  ;;  %v3575_v63 = vld [vmem:[%s3362_s27 + $0x138] sm:$0xff] }
  0x2b   : > { %5521 = vst [vmem:[#allocation16_spill] sm:$0xff] %v3535_v28  ;;  %2552 = vrot.lane.b32.xlu1 %v2551_v57, %s3278_s28  ;;  %v2561_v38 = vpack.i.bf16 %v397_v27, %v3524_v19  ;;  %v392_v39 = vsel %vm357_vm0, %v3512_v9, %v391_v20  ;;  %v398_v41 = vrot.slane %v3515_v10, 2  ;;  %v3553_v44 = vrot.slane %v3518_v14, 2  ;;  %v3556_v45 = vld [vmem:[%s3362_s27 + $0x118] sm:$0xf]  ;;  %v3559_v46 = vld [vmem:[%s3362_s27 + $0xf0] sm:$0xff] }
  0x2c   : > { %5522 = vst [vmem:[#allocation17_spill] sm:$0xff] %v3538_v29  ;;  %v3566_v53 = vsel %vm357_vm0, %v403_v21, %v3538_v29  ;;  %v407_v54 = vsel %vm357_vm0, %v3538_v29, %v406_v32  ;;  %v401_v57 = vrot.slane %v3529_v26, 2  ;;  %v3572_v59 = vld [vmem:[%s3362_s27 + $0x100] sm:$0xf]  ;;  %5525 = vst [vmem:[#allocation20_spill] sm:$0xff] %v3575_v63  ;;  %v2556_v3 = vpack.i.bf16 %v392_v39, %v3535_v28  ;;  %v3612_v9 = vld [vmem:[%s3362_s27 + $0x128] sm:$0xff] }
  0x2d   : > { %5523 = vst [vmem:[#allocation18_spill] sm:$0xff] %v3553_v44  ;;  %5524 = vst [vmem:[#allocation19_spill] sm:$0xff] %v3566_v53  ;;  %2547 = vrot.lane.b32.xlu0 %v2546_v15, %s3278_s28  ;;  %v3581_v5 = vsel %vm357_vm0, %v398_v41, %v3553_v44  ;;  %v413_v20 = vrot.slane %v3542_v34, 2  ;;  %v3585_v21 = vrot.slane %v3545_v35, 2  ;;  %v3588_v27 = vld [vmem:[%s3362_s27 + $0x140] sm:$0xff]  ;;  %v416_v39 = vrot.slane %v3556_v45, 2 }
  0x2e   : > { %5526 = vst [vmem:[#allocation21_spill] sm:$0xff] %v3581_v5  ;;  %5528 = vst [vmem:[#allocation23_spill] sm:$0xff] %v3588_v27  ;;  %v3591_v32 = vld [vmem:[%s3362_s27 + $0x148] sm:$0xf]  ;;  %v402_v15 = vsel %vm357_vm0, %v3553_v44, %v401_v57  ;;  %v408_v41 = vrot.slane %v3559_v46, 2  ;;  %v3598_v29 = vrot.slane %v3562_v51, 2  ;;  %v2571_v19 = vpack.i.bf16 %v407_v54, %v3566_v53 }
  0x2f   : > { %5527 = vst [vmem:[#allocation22_spill] sm:$0xff] %v3585_v21  ;;  %2562 = vrot.lane.b32.xlu1 %v2561_v38, %s3278_s28  ;;  %v3604_v60 = vsel %vm357_vm0, %v413_v20, %v3585_v21  ;;  %v411_v57 = vrot.slane %v3572_v59, 2  ;;  %v423_v44 = vrot.slane %v3575_v63, 2  ;;  %v3609_v28 = vld [vmem:[%s3362_s27 + $0x120] sm:$0xff]  ;;  %5531 = vst [vmem:[#allocation26_spill] sm:$0xff] %v3612_v9  ;;  %v417_v38 = vsel %vm357_vm0, %v3585_v21, %v416_v39  ;;  %v3624_v53 = vld [vmem:[%s3362_s27 + $0x168] sm:$0xff] }
  0x30   : > { %5529 = vst [vmem:[#allocation24_spill] sm:$0xff] %v3598_v29  ;;  %5530 = vst [vmem:[#allocation25_spill] sm:$0xff] %v3604_v60  ;;  %v3615_v52 = vld [vmem:[%s3362_s27 + $0x130] sm:$0xf]  ;;  %v3620_v54 = vrot.slane %v3588_v27, 2  ;;  %v426_v20 = vrot.slane %v3591_v32, 2  ;;  %v2566_v33 = vpack.i.bf16 %v402_v15, %v3581_v5  ;;  %v2581_v22 = vpack.i.bf16 %v417_v38, %v3604_v60 }
  0x31   : > { %5532 = vst [vmem:[#allocation27_spill] sm:$0xff] %v3615_v52  ;;  %v3627_v40 = vld [vmem:[%s3362_s27 + $0x170] sm:$0xff]  ;;  %2557 = vrot.lane.b32.xlu0 %v2556_v3, %s3278_s28  ;;  %v3634_v58 = vsel %vm357_vm0, %v408_v41, %v3598_v29  ;;  %v3637_v39 = vld [vmem:[%s3362_s27 + $0x178] sm:$0xf]  ;;  %v412_v13 = vsel %vm357_vm0, %v3598_v29, %v411_v57  ;;  %v418_v4 = vrot.slane %v3609_v28, 2  ;;  %v3649_v3 = vrot.slane %v3612_v9, 2 }
  0x32   : > { %5533 = vst [vmem:[#allocation28_spill] sm:$0xff] %v3620_v54  ;;  %5534 = vst [vmem:[#allocation29_spill] sm:$0xff] %v3634_v58  ;;  %v3640_v21 = vld [vmem:[%s3362_s27 + $0x150] sm:$0xff]  ;;  %v3643_v47 = vld [vmem:[%s3362_s27 + $0x158] sm:$0xff]  ;;  %v421_v15 = vrot.slane %v3615_v52, 2  ;;  %v3658_v41 = vsel %vm357_vm0, %v423_v44, %v3620_v54  ;;  %v427_v5 = vsel %vm357_vm0, %v3620_v54, %v426_v20  ;;  %v433_v57 = vrot.slane %v3624_v53, 2 }
  0x33   : > { %5535 = vst [vmem:[#allocation30_spill] sm:$0xff] %v3637_v39  ;;  %5536 = vst [vmem:[#allocation31_spill] sm:$0xff] %v3640_v21  ;;  %v3653_v38 = vld [vmem:[%s3362_s27 + $0x160] sm:$0xf]  ;;  %2572 = vrot.lane.b32.xlu1 %v2571_v19, %s3278_s28  ;;  %v434_v29 = vrot.slane %v3627_v40, 2  ;;  %v436_v60 = vrot.slane %v3637_v39, 2  ;;  %v2576_v19 = vpack.i.bf16 %v412_v13, %v3634_v58  ;;  %v2591_v20 = vpack.i.bf16 %v427_v5, %v3658_v41 }
  0x34   : > { %5537 = vst [vmem:[#allocation32_spill] sm:$0xff] %v3643_v47  ;;  %5538 = vst [vmem:[#allocation33_spill] sm:$0xff] %v3658_v41  ;;  %v428_v9 = vrot.slane %v3640_v21, 2  ;;  %v3667_v52 = vrot.slane %v3643_v47, 2  ;;  %v431_v44 = vrot.slane %v3653_v38, 2  ;;  %v3675_v54 = vsel %vm357_vm0, %v418_v4, %v3649_v3  ;;  %s150_s20 = scalar_lea.vmem [#allocation2], %s2243_s18 }
  0x35   : > { %2567 = vrot.lane.b32.xlu0 %v2566_v33, %s3278_s28  ;;  %v422_v39 = vsel %vm357_vm0, %v3649_v3, %v421_v15  ;;  %v435_v21 = vsel %vm357_vm0, %v433_v57, %v434_v29  ;;  %v437_v33 = vsel %vm357_vm0, %v434_v29, %v436_v60  ;;  %v540_v58 = vrot.slane %v3406_v17, 4  ;;  %s2158_s23 = sshll.u32 %s150_s20, 4  ;;  %s3286_s12 = smov [#allocation2]   ;;  %s5379_s23 = int_to_ptr.vmem [resolvable:$true] %s2158_s23 }
  0x36   : > { %v3684_v13 = vsel %vm357_vm0, %v428_v9, %v3667_v52  ;;  %v541_v5 = vrot.slane %v3409_v18, 4  ;;  %v432_v4 = vsel %vm357_vm0, %v3667_v52, %v431_v44  ;;  %v543_v41 = vrot.slane %v3418_v23, 4 }
  0x37   : > { %2582 = vrot.lane.b32.xlu1 %v2581_v22, %s3278_s28  ;;  %v535_v15 = vrot.slane %v3379_v6, 4  ;;  %v536_v57 = vrot.slane %v3382_v7, 4  ;;  %v538_v22 = vrot.slane %v3385_v8, 4  ;;  %v2586_v60 = vpack.i.bf16 %v422_v39, %v3675_v54 }
  0x38   : > { %v550_v9 = vrot.slane %v3390_v11, 4  ;;  %v3698_v17 = vrot.slane %v3393_v12, 4  ;;  %v553_v18 = vrot.slane %v3403_v16, 4  ;;  %v548_v29 = vrot.slane %v3371_v2, 4 }
  0x39   : > { %2577 = vrot.lane.b32.xlu0 %v2576_v19, %s3278_s28  ;;  %v2601_v6 = vpack.i.bf16 %v437_v33, %v435_v21  ;;  %v2596_v7 = vpack.i.bf16 %v432_v4, %v3684_v13  ;;  %v542_v8 = vsel %vm534_vm1, %v540_v58, %v541_v5  ;;  %v544_v23 = vsel %vm534_vm1, %v541_v5, %v543_v41 }
  0x3a   : > { %v537_v39 = vsel %vm534_vm1, %v535_v15, %v536_v57  ;;  %v545_v19 = vrot.slane %v3365_v0, 4  ;;  %v3709_v44 = vrot.slane %v3368_v1, 4  ;;  %v539_v2 = vsel %vm534_vm1, %v536_v57, %v538_v22 }
  0x3b   : > { %2592 = vrot.lane.b32.xlu1 %v2591_v20, %s3278_s28  ;;  %v560_v16 = vrot.slane %v3421_v24, 4  ;;  %v3715_v21 = vrot.slane %v3424_v25, 4  ;;  %v563_v58 = vrot.slane %v3431_v30, 4  ;;  %v3720_v41 = vsel %vm534_vm1, %v550_v9, %v3698_v17 }
  0x3c   : > { %5539 = vst [vmem:[#allocation34_spill] sm:$0xff] %v3709_v44  ;;  %5540 = vst [vmem:[#allocation35_spill] sm:$0xff] %v3720_v41  ;;  %v554_v20 = vsel %vm534_vm1, %v3698_v17, %v553_v18  ;;  %v2611_v33 = vpack.i.bf16 %v544_v23, %v542_v8  ;;  %v555_v5 = vrot.slane %v3434_v31, 4  ;;  %v3727_v4 = vrot.slane %v3444_v36, 4 }
  0x3d   : > { %2587 = vrot.lane.b32.xlu0 %v2586_v60, %s3278_s28  ;;  %v558_v15 = vrot.slane %v3447_v37, 4  ;;  %v2606_v57 = vpack.i.bf16 %v539_v2, %v537_v39  ;;  %v3732_v30 = vsel %vm534_vm1, %v545_v19, %v3709_v44  ;;  %v2621_v22 = vpack.i.bf16 %v554_v20, %v3720_v41 }
  0x3e   : > { %5541 = vst [vmem:[#allocation36_spill] sm:$0xff] %v3732_v30  ;;  %v549_v60 = vsel %vm534_vm1, %v3709_v44, %v548_v29  ;;  %v3740_v9 = vsel %vm534_vm1, %v560_v16, %v3715_v21  ;;  %v564_v18 = vsel %vm534_vm1, %v3715_v21, %v563_v58  ;;  %v570_v37 = vrot.slane %v3457_v42, 4 }
  0x3f   : > { %2602 = vrot.lane.b32.xlu1 %v2601_v6, %s3278_s28  ;;  %v3746_v6 = vrot.slane %v3460_v43, 4  ;;  %v573_v8 = vrot.slane %v3470_v48, 4  ;;  %v3753_v29 = vsel %vm534_vm1, %v555_v5, %v3727_v4  ;;  %v559_v23 = vsel %vm534_vm1, %v3727_v4, %v558_v15 }
  0x40   : > { %v3758_v39 = vrot.slane %v3476_v50, 4  ;;  %v568_v19 = vrot.slane %v3486_v55, 4  ;;  %v580_v2 = vrot.slane %v3489_v56, 4  ;;  %v3763_v48 = vrot.slane %v3502_v61, 4 }
  0x41   : > { %2597 = vrot.lane.b32.xlu0 %v2596_v7, %s3278_s28  ;;  %5542 = vst [vmem:[#allocation37_spill] sm:$0xff] %v3746_v6  ;;  %v565_v7 = vrot.slane %v3473_v49, 4  ;;  %v583_v16 = vrot.slane %v3505_v62, 4  ;;  %v2616_v58 = vpack.i.bf16 %v549_v60, %v3732_v30  ;;  %v2631_v20 = vpack.i.bf16 %v564_v18, %v3740_v9  ;;  %s2142_s28 = scalar_lea.sflag [#allocation3], %s148_s16 }
  0x42   : > { %5543 = vst [vmem:[#allocation38_spill] sm:$0xff] %v3758_v39  ;;  %5544 = vst [vmem:[#allocation39_spill] sm:$0xff] %v3763_v48  ;;  %v3772_v5 = vsel %vm534_vm1, %v570_v37, %v3746_v6  ;;  %v574_v55 = vsel %vm534_vm1, %v3746_v6, %v573_v8  ;;  %v569_v15 = vsel %vm534_vm1, %v3758_v39, %v568_v19  ;;  %v3785_v60 = vrot.slane %v3518_v14, 4 }
  0x43   : > { %2612 = vrot.lane.b32.xlu1 %v2611_v33, %s3279_s29  ;;  %v2626_v33 = vpack.i.bf16 %v559_v23, %v3753_v29  ;;  %5545 = vst [vmem:[#allocation40_spill] sm:$0xff] %v3772_v5  ;;  %v3779_v62 = vsel %vm534_vm1, %v565_v7, %v3758_v39  ;;  %v3789_v18 = vsel %vm534_vm1, %v580_v2, %v3763_v48  ;;  %v590_v8 = vrot.slane %v3542_v34, 4  ;;  %v3867_v39 = vld [vmem:[%s3362_s27 + $0x118] sm:$0xf] }
  0x44   : > { %5546 = vst [vmem:[#allocation41_spill] sm:$0xff] %v3779_v62  ;;  %5547 = vst [vmem:[#allocation42_spill] sm:$0xff] %v3785_v60  ;;  %v584_v37 = vsel %vm534_vm1, %v3763_v48, %v583_v16  ;;  %v3797_v7 = vrot.slane %v3545_v35, 4  ;;  %v593_v23 = vrot.slane %v3556_v45, 4  ;;  %v585_v19 = vrot.slane %v3559_v46, 4 }
  0x45   : > { %2607 = vrot.lane.b32.xlu0 %v2606_v57, %s3279_s29  ;;  %v575_v57 = vrot.slane %v3515_v10, 4  ;;  %5548 = vst [vmem:[#allocation43_spill] sm:$0xff] %v3789_v18  ;;  %v3802_v6 = vrot.slane %v3562_v51, 4  ;;  %v588_v2 = vrot.slane %v3572_v59, 4  ;;  %v600_v16 = vrot.slane %v3575_v63, 4 }
  0x46   : > { %5549 = vst [vmem:[#allocation44_spill] sm:$0xff] %v3797_v7  ;;  %v603_v45 = vrot.slane %v3591_v32, 4  ;;  %v2636_v48 = vpack.i.bf16 %v569_v15, %v3779_v62  ;;  %v2651_v30 = vpack.i.bf16 %v584_v37, %v3789_v18  ;;  %v594_v32 = vsel %vm534_vm1, %v3797_v7, %v593_v23  ;;  %v5553_v37 = vld [vmem:[#allocation26_spill] sm:$0xff]  ;;  %v3845_v18 = vld [vmem:[%s3362_s27 + $0x130] sm:$0xf] }
  0x47   : > { %2622 = vrot.lane.b32.xlu1 %v2621_v22, %s3279_s29  ;;  %v578_v22 = vrot.slane %v3529_v26, 4  ;;  %v3807_v26 = vrot.slane %v3588_v27, 4  ;;  %v3816_v59 = vsel %vm534_vm1, %v575_v57, %v3785_v60  ;;  %v589_v15 = vsel %vm534_vm1, %v3802_v6, %v588_v2  ;;  %5554 = vst [vmem:[#allocation26_spill] sm:$0xff] %v3845_v18  ;;  %v2295_v63 = vld [vmem:[%s3362_s27 + $0x70] sm:$0xf] }
  0x48   : > { %5550 = vst [vmem:[#allocation45_spill] sm:$0xff] %v3816_v59  ;;  %v595_v57 = vrot.slane %v3609_v28, 4 }
  0x49   : > { %2617 = vrot.lane.b32.xlu0 %v2616_v58, %s3279_s29  ;;  %v2641_v58 = vpack.i.bf16 %v574_v55, %v3772_v5  ;;  %v579_v27 = vsel %vm534_vm1, %v3785_v60, %v578_v22  ;;  %v3829_v55 = vsel %vm534_vm1, %v585_v19, %v3802_v6  ;;  %v3839_v22 = vrot.slane %v5553_v37, 4  ;;  %v5555_v19 = vld [vmem:[#allocation27_spill] sm:$0xff] }
  0x4a   : > { %5552 = vst [vmem:[#allocation47_spill] sm:$0xff] %v3829_v55  ;;  %v604_v23 = vsel %vm534_vm1, %v3807_v26, %v603_v45  ;;  %v598_v2 = vrot.slane %v5555_v19, 4  ;;  %v611_v60 = vrot.slane %v3627_v40, 4  ;;  %v2646_v44 = vpack.i.bf16 %v579_v27, %v3816_v59  ;;  %5557 = vst [vmem:[#allocation27_spill] sm:$0xff] %v3867_v39 }
  0x4b   : > { %2632 = vrot.lane.b32.xlu1 %v2631_v20, %s3279_s29  ;;  %v3823_v20 = vsel %vm534_vm1, %v590_v8, %v3797_v7  ;;  %v3842_v8 = vld [vmem:[%s3362_s27 + $0x40] sm:$0xf]  ;;  %v5556_v7 = vld [vmem:[#allocation30_spill] sm:$0xff]  ;;  %v1394_v40 = vrot.slane %v3845_v18, 2 }
  0x4c   : > { %5551 = vst [vmem:[#allocation46_spill] sm:$0xff] %v3823_v20  ;;  %v613_v5 = vrot.slane %v5556_v7, 4  ;;  %v2661_v62 = vpack.i.bf16 %v594_v32, %v3823_v20  ;;  %v858_v45 = vrot.slane %v3842_v8, 2  ;;  %v1354_v7 = vrot.slane %v2295_v63, 2  ;;  %v5558_v32 = vld [vmem:[#allocation31_spill] sm:$0xff] }
  0x4d   : > { %2627 = vrot.lane.b32.xlu0 %v2626_v33, %s3279_s29  ;;  %v3835_v33 = vsel %vm534_vm1, %v600_v16, %v3807_v26  ;;  %v610_v16 = vrot.slane %v3624_v53, 4  ;;  %v3863_v53 = vsel %vm534_vm1, %v595_v57, %v3839_v22  ;;  %v599_v27 = vsel %vm534_vm1, %v3839_v22, %v598_v2  ;;  %v2250_v2 = vld [vmem:[%s3362_s27 + $0x58] sm:$0xf] }
  0x4e   : > { %v2671_v19 = vpack.i.bf16 %v604_v23, %v3835_v33  ;;  %v5559_v23 = vld [vmem:[#allocation5_spill] sm:$0xff]  ;;  %v614_v57 = vsel %vm534_vm1, %v611_v60, %v613_v5  ;;  %v3880_v20 = vrot.slane %v3643_v47, 4  ;;  %v2691_v47 = vpack.i.bf16 %v3393_v12, %v3390_v11  ;;  %v5571_v11 = vld [vmem:[#allocation8_spill] sm:$0xff] }
  0x4f   : > { %2642 = vrot.lane.b32.xlu1 %v2641_v58, %s3279_s29  ;;  %v2656_v58 = vpack.i.bf16 %v589_v15, %v3829_v55  ;;  %v605_v15 = vrot.slane %v5558_v32, 4  ;;  %v3876_v59 = vsel %vm357_vm0, %v5559_v23, %v858_v45  ;;  %v5563_v23 = vld [vmem:[#allocation10_spill] sm:$0xff]  ;;  %v1530_v32 = vrot.slane %v2295_v63, 4 }
  0x50   : > { %5560 = vst [vmem:[#allocation30_spill] sm:$0xff] %v3876_v59  ;;  %v3895_v5 = vsel %vm357_vm0, %v5563_v23, %v1354_v7  ;;  %v2322_v55 = vld [vmem:[%s3362_s27 + $0x148] sm:$0xf]  ;;  %v1039_v18 = vrot.slane %v2250_v2, 4 }
  0x51   : > { %2637 = vrot.lane.b32.xlu0 %v2636_v48, %s3279_s29  ;;  %v612_v48 = vsel %vm534_vm1, %v610_v16, %v611_v60  ;;  %v608_v16 = vrot.slane %v3653_v38, 4  ;;  %v903_v60 = vrot.slane %v3867_v39, 2  ;;  %v5565_v7 = vld [vmem:[#allocation22_spill] sm:$0xff]  ;;  %v863_v39 = vrot.slane %v2250_v2, 2 }
  0x52   : > { %v2681_v45 = vpack.i.bf16 %v614_v57, %v612_v48  ;;  %v3917_v12 = vsel %vm534_vm1, %v3727_v4, %v1530_v32  ;;  %v1399_v63 = vrot.slane %v2322_v55, 2  ;;  %v2277_v48 = vld [vmem:[%s3362_s27 + $0x130] sm:$0xf]  ;;  %v3932_v32 = vsel %vm534_vm1, %v3698_v17, %v1039_v18 }
  0x53   : > { %2652 = vrot.lane.b32.xlu1 %v2651_v30, %s3279_s29  ;;  %v3886_v30 = vsel %vm357_vm0, %v3649_v3, %v1394_v40  ;;  %v2666_v40 = vpack.i.bf16 %v599_v27, %v3863_v53  ;;  %v3911_v27 = vsel %vm534_vm1, %v605_v15, %v3880_v20  ;;  %v609_v57 = vsel %vm534_vm1, %v3880_v20, %v608_v16  ;;  %v5569_v15 = vld [vmem:[#allocation7_spill] sm:$0xff]  ;;  %v5572_v16 = vld [vmem:[#allocation28_spill] sm:$0xff] }
  0x54   : > { %5562 = vst [vmem:[#allocation5_spill] sm:$0xff] %v3886_v30  ;;  %v3907_v30 = vsel %vm357_vm0, %v5565_v7, %v903_v60  ;;  %v3928_v60 = vsel %vm357_vm0, %v5569_v15, %v863_v39  ;;  %5570 = vst [vmem:[#allocation22_spill] sm:$0xff] %v3932_v32  ;;  %v2253_v7 = vld [vmem:[%s3362_s27 + $0x70] sm:$0xf]  ;;  %v3941_v59 = vsel %vm357_vm0, %v5572_v16, %v1399_v63  ;;  %v1575_v2 = vrot.slane %v2322_v55, 4  ;;  %v5573_v39 = vld [vmem:[#allocation33_spill] sm:$0xff] }
  0x55   : > { %2647 = vrot.lane.b32.xlu0 %v2646_v44, %s3279_s29  ;;  %v5564_v44 = vld [vmem:[#allocation12_spill] sm:$0xff]  ;;  %5566 = vst [vmem:[#allocation10_spill] sm:$0xff] %v3907_v30  ;;  %v2821_v15 = vpack.i.bf16 %v3941_v59, %v5573_v39  ;;  %v908_v17 = vrot.slane %v2277_v48, 2  ;;  %v2676_v30 = vpack.i.bf16 %v609_v57, %v3911_v27  ;;  %v868_v41 = vrot.slane %v2253_v7, 2  ;;  %v2325_v32 = vld [vmem:[%s3362_s27 + $0x160] sm:$0xf] }
  0x56   : > { %5568 = vst [vmem:[#allocation12_spill] sm:$0xff] %v3917_v12  ;;  %v3949_v38 = vsel %vm534_vm1, %v3807_v26, %v1575_v2  ;;  %v1404_v2 = vrot.slane %v2325_v32, 2 }
  0x57   : > { %2662 = vrot.lane.b32.xlu1 %v2661_v62, %s3279_s29  ;;  %v2298_v62 = vld [vmem:[%s3362_s27 + $0x88] sm:$0xf] }
  0x58   : > { %v1359_v12 = vrot.slane %v2298_v62, 2  ;;  %v1535_v18 = vrot.slane %v2298_v62, 4  ;;  %v3961_v62 = vsel %vm357_vm0, %v3649_v3, %v908_v17  ;;  %v3982_v17 = vsel %vm357_vm0, %v5563_v23, %v868_v41  ;;  %v2256_v41 = vld [vmem:[%s3362_s27 + $0x88] sm:$0xf] }
  0x59   : > { %2657 = vrot.lane.b32.xlu0 %v2656_v58, %s3279_s29  ;;  %v1084_v58 = vrot.slane %v2277_v48, 4  ;;  %v5575_v48 = vld [vmem:[#allocation11_spill] sm:$0xff]  ;;  %v3995_v3 = vsel %vm357_vm0, %v3667_v52, %v1404_v2 }
  0x5a   : > { %v3965_v57 = vsel %vm534_vm1, %v3715_v21, %v1535_v18  ;;  %v1044_v18 = vrot.slane %v2253_v7, 4  ;;  %v2871_v7 = vpack.i.bf16 %v3995_v3, %v3684_v13 }
  0x5b   : > { %2672 = vrot.lane.b32.xlu1 %v2671_v19, %s3279_s29  ;;  %v5574_v19 = vld [vmem:[#allocation9_spill] sm:$0xff]  ;;  %v2836_v55 = vpack.i.bf16 %v3965_v57, %v3740_v9  ;;  %v5613_v57 = vpack.i.bf16 %v3982_v17, %v5564_v44 }
  0x5c   : > { %v3957_v63 = vsel %vm357_vm0, %v5574_v19, %v1359_v12  ;;  %v3975_v12 = vsel %vm534_vm1, %v3839_v22, %v1084_v58  ;;  %v2686_v58 = vpack.i.bf16 %v3368_v1, %v3365_v0  ;;  %v4005_v0 = vpack.i.bf16 %v3424_v25, %v3421_v24  ;;  %v2280_v1 = vld [vmem:[%s3362_s27 + $0x148] sm:$0xf] }
  0x5d   : > { %2667 = vrot.lane.b32.xlu0 %v2666_v40, %s3279_s29  ;;  %v1580_v40 = vrot.slane %v2325_v32, 4  ;;  %v913_v24 = vrot.slane %v2280_v1, 2  ;;  %v1049_v25 = vrot.slane %v2256_v41, 4 }
  0x5f   : > { %2682 = vrot.lane.b32.xlu1 %v2681_v45, %s3279_s29  ;;  %v3991_v45 = vsel %vm534_vm1, %v3727_v4, %v1044_v18  ;;  %v4010_v52 = vsel %vm534_vm1, %v3880_v20, %v1580_v40  ;;  %v873_v4 = vrot.slane %v2256_v41, 2  ;;  %v2711_v20 = vpack.i.bf16 %v3460_v43, %v3457_v42  ;;  %v2271_v18 = vld [vmem:[%s3362_s27 + $0x100] sm:$0xf]  ;;  %v5576_v41 = vld [vmem:[#allocation24_spill] sm:$0xff] }
  0x60   : > { %v2856_v23 = vpack.i.bf16 %v3991_v45, %v3753_v29  ;;  %v2881_v32 = vpack.i.bf16 %v4010_v52, %v3911_v27  ;;  %v1089_v40 = vrot.slane %v2280_v1, 4  ;;  %v4219_v45 = vld [vmem:[%s3362_s27 + $0xa8] sm:$0xff] }
  0x61   : > { %2677 = vrot.lane.b32.xlu0 %v2676_v30, %s3279_s29  ;;  %v2696_v30 = vpack.i.bf16 %v3444_v36, %v3434_v31  ;;  %v4029_v31 = vsel %vm357_vm0, %v5572_v16, %v913_v24  ;;  %v4033_v36 = vsel %vm534_vm1, %v3715_v21, %v1049_v25  ;;  %v1034_v25 = vrot.slane %v3842_v8, 4  ;;  %s3198_s29 = scalar_lea.vmem %s5379_s23, 256 }
  0x62   : > { %v2896_v42 = vpack.i.bf16 %v4029_v31, %v5573_v39  ;;  %v2911_v43 = vpack.i.bf16 %v4033_v36, %v3740_v9  ;;  %v4045_v16 = vsel %vm534_vm1, %v3807_v26, %v1089_v40  ;;  %v2731_v26 = vpack.i.bf16 %v3545_v35, %v3542_v34  ;;  %v3166_v31 = vld [vmem:[%s3362_s27 + $0x50] sm:$0xff]  ;;  %p3199_p12 = scmp.ne.s32.totalorder %s5379_s23, %s3198_s29 }
  0x63   : > { %2692 = vrot.lane.b32.xlu1 %v2691_v47, %s3280_s30  ;;  %v4019_v47 = vsel %vm357_vm0, %v5574_v19, %v873_v4  ;;  %v2706_v19 = vpack.i.bf16 %v3476_v50, %v3473_v49  ;;  %v2906_v21 = vpack.i.bf16 %v4045_v16, %v3835_v33  ;;  %v2721_v49 = vpack.i.bf16 %v3502_v61, %v3489_v56  ;;  %v5577_v61 = vld [vmem:[#allocation29_spill] sm:$0xff]  ;;  %v3169_v16 = vld [vmem:[%s3362_s27 + $0x78] sm:$0xff] }
  0x64   : > { %v2901_v2 = vpack.i.bf16 %v4019_v47, %v5575_v48  ;;  %v898_v50 = vrot.slane %v2271_v18, 2  ;;  %v1074_v4 = vrot.slane %v2271_v18, 4  ;;  %v2726_v56 = vpack.i.bf16 %v3562_v51, %v3559_v46  ;;  %v5578_v46 = vld [vmem:[#allocation47_spill] sm:$0xff]  ;;  %v4085_v18 = vld [vmem:[%s3362_s27 + $0xb8] sm:$0xf]  ;;  %p3200_p13 = pnand %p3199_p12, %p3342_p4 }
  0x65   : > { %2687 = vrot.lane.b32.xlu0 %v2686_v58, %s3280_s30  ;;  %v2716_v58 = vpack.i.bf16 %v3518_v14, %v3515_v10  ;;  %v4068_v14 = vld [vmem:[%s3362_s27 + $0xa0] sm:$0xf]  ;;  %v2736_v34 = vpack.i.bf16 %v5553_v37, %v3609_v28  ;;  %v5581_v28 = vld [vmem:[#allocation34_spill] sm:$0xff]  ;;  %v1059_v8 = vrot.slane %v4085_v18, 4 }
  0x66   : > { %v899_v1 = vsel %vm357_vm0, %v5576_v41, %v898_v50  ;;  %v1075_v10 = vsel %vm534_vm1, %v3802_v6, %v1074_v4  ;;  %v1054_v35 = vrot.slane %v4068_v14, 4  ;;  %v5580_v6 = vld [vmem:[#allocation41_spill] sm:$0xff]  ;;  %v1035_v37 = vsel %vm534_vm1, %v5581_v28, %v1034_v25  ;;  %p3201_p0 = pneg %p3200_p13 }
  0x67   : > { %2702 = vrot.lane.b32.xlu1 %v4005_v0, %s3280_s30  ;;  %v2741_v24 = vpack.i.bf16 %v899_v1, %v5577_v61  ;;  %v2751_v51 = vpack.i.bf16 %v1075_v10, %v5578_v46  ;;  %v5586_v1 = vld [vmem:[#allocation36_spill] sm:$0xff]  ;;  %v5589_v25 = vld [vmem:[#allocation5_spill] sm:$0xff] }
  0x68   : > { %v2756_v4 = vpack.i.bf16 %v1035_v37, %v5586_v1  ;;  %v5590_v46 = vpack.i.bf16 %v5589_v25, %v3675_v54  ;;  %v5593_v37 = vpack.i.bf16 %v3895_v5, %v5564_v44  ;;  %v5600_v1 = vld [vmem:[#allocation20_spill] sm:$0xff]  ;;  %v5602_v5 = vpack.i.bf16 %v3928_v60, %v5571_v11  ;;  %v5604_v25 = vld [vmem:[#allocation35_spill] sm:$0xff] }
  0x69   : > { %2697 = vrot.lane.b32.xlu0 %v2696_v30, %s3280_s30 }
  0x6b   : > { %2712 = vrot.lane.b32.xlu1 %v2711_v20, %s3280_s30  ;;  %v5579_v20 = vld [vmem:[#allocation38_spill] sm:$0xff] }
  0x6c   : > { %v4079_v40 = vsel %vm534_vm1, %v5579_v20, %v1054_v35  ;;  %v5591_v20 = vld [vmem:[#allocation27_spill] sm:$0xff] }
  0x6d   : > { %2707 = vrot.lane.b32.xlu0 %v2706_v19, %s3280_s30  ;;  %v1079_v28 = vrot.slane %v5591_v20, 4 }
  0x6f   : > { %2722 = vrot.lane.b32.xlu1 %v2721_v49, %s3280_s30  ;;  %v5582_v49 = vld [vmem:[#allocation26_spill] sm:$0xff] }
  0x70   : > { %v1570_v50 = vrot.slane %v5582_v49, 4  ;;  %v5595_v49 = vld [vmem:[#allocation25_spill] sm:$0xff] }
  0x71   : > { %2717 = vrot.lane.b32.xlu0 %v2716_v58, %s3280_s30  ;;  %v5583_v58 = vld [vmem:[#allocation30_spill] sm:$0xff] }
  0x72   : > { %v1571_v35 = vsel %vm534_vm1, %v3839_v22, %v1570_v50 }
  0x73   : > { %2732 = vrot.lane.b32.xlu1 %v2731_v26, %s3280_s30  ;;  %v5584_v26 = vld [vmem:[#allocation6_spill] sm:$0xff] }
  0x74   : > { %v5585_v41 = vpack.i.bf16 %v5583_v58, %v5584_v26  ;;  %v5597_v58 = vld [vmem:[#allocation46_spill] sm:$0xff] }
  0x75   : > { %2727 = vrot.lane.b32.xlu0 %v2726_v56, %s3280_s30  ;;  %v5587_v56 = vld [vmem:[#allocation37_spill] sm:$0xff] }
  0x76   : > { %v4099_v61 = vsel %vm534_vm1, %v5587_v56, %v1059_v8  ;;  %v5594_v8 = vld [vmem:[#allocation10_spill] sm:$0xff] }
  0x77   : > { %2742 = vrot.lane.b32.xlu1 %v2741_v24, %s3281_s3  ;;  %v5588_v24 = vld [vmem:[#allocation40_spill] sm:$0xff]  ;;  %v5596_v50 = vpack.i.bf16 %v5594_v8, %v5595_v49 }
  0x78   : > { %v5612_v8 = vld [vmem:[#allocation32_spill] sm:$0xff] }
  0x79   : > { %2737 = vrot.lane.b32.xlu0 %v2736_v34, %s3280_s30 }
  0x7b   : > { %2752 = vrot.lane.b32.xlu1 %v2751_v51, %s3282_s4  ;;  %v2781_v51 = vpack.i.bf16 %v1571_v35, %v3863_v53  ;;  %v5603_v35 = vld [vmem:[#allocation22_spill] sm:$0xff] }
  0x7d   : > { %2747 = vrot.lane.b32.xlu0 %v5585_v41, %s3281_s3 }
  0x7f   : > { %2762 = vrot.lane.b32.xlu1 %v2736_v34, %s3283_s5  ;;  %v5592_v34 = vld [vmem:[#allocation44_spill] sm:$0xff] }
  0x80   : > { %v1080_v22 = vsel %vm534_vm1, %v5592_v34, %v1079_v28  ;;  %v5607_v28 = vpack.i.bf16 %v3949_v38, %v3835_v33  ;;  %v5608_v34 = vpack.i.bf16 %v3957_v63, %v5575_v48  ;;  %v5610_v63 = vpack.i.bf16 %v3975_v12, %v3863_v53 }
  0x81   : > { %2757 = vrot.lane.b32.xlu0 %v2756_v4, %s3282_s4  ;;  %v2801_v26 = vpack.i.bf16 %v1080_v22, %v5597_v58  ;;  %v5601_v4 = vld [vmem:[#allocation23_spill] sm:$0xff] }
  0x82   : > { %v4133_v56 = vpack.i.bf16 %v5601_v4, %v5600_v1 }
  0x83   : > { %2772 = vrot.lane.b32.xlu1 %v5590_v46, %s3284_s6  ;;  %v5605_v46 = vpack.i.bf16 %v5603_v35, %v5604_v25  ;;  %v2304_v25 = vld [vmem:[%s3362_s27 + $0xb8] sm:$0xf] }
  0x84   : > { %v1545_v52 = vrot.slane %v2304_v25, 4 }
  0x85   : > { %2767 = vrot.lane.b32.xlu0 %v2696_v30, %s3283_s5  ;;  %v5598_v30 = vld [vmem:[#allocation12_spill] sm:$0xff] }
  0x86   : > { %v5599_v41 = vpack.i.bf16 %v5598_v30, %v3753_v29  ;;  %v4216_v29 = vld [vmem:[%s3362_s27 + $0xb0] sm:$0xff] }
  0x87   : > { %2782 = vrot.lane.b32.xlu1 %v2781_v51, %s3285_s7  ;;  %v1367_v13 = vrot.slane %v4216_v29, 2  ;;  %v1543_v3 = vrot.slane %v4216_v29, 4 }
  0x89   : > { %2777 = vrot.lane.b32.xlu0 %v5593_v37, %s3284_s6  ;;  %v5611_v37 = vld [vmem:[#allocation31_spill] sm:$0xff] }
  0x8a   : > { %v2861_v49 = vpack.i.bf16 %v5612_v8, %v5611_v37  ;;  %v1366_v8 = vrot.slane %v4219_v45, 2 }
  0x8b   : > { %2792 = vrot.lane.b32.xlu1 %v5596_v50, %s3281_s3  ;;  %v2299_v50 = vld [vmem:[%s3362_s27 + $0x90] sm:$0xff] }
  0x8d   : > { %2787 = vrot.lane.b32.xlu0 %v5599_v41, %s3285_s7  ;;  %v1537_v41 = vrot.slane %v2299_v50, 4 }
  0x8f   : > { %2802 = vrot.lane.b32.xlu1 %v2801_v26, %s3282_s4  ;;  %v1361_v26 = vrot.slane %v2299_v50, 2 }
  0x91   : > { %2797 = vrot.lane.b32.xlu0 %v5602_v5, %s3281_s3 }
  0x93   : > { %2812 = vrot.lane.b32.xlu1 %v4133_v56, %s3283_s5 }
  0x95   : > { %2807 = vrot.lane.b32.xlu0 %v5605_v46, %s3282_s4  ;;  %v4145_v51 = vpop.permute.xlu1 %2537 }
  0x97   : > { %v4147_v20 = vpop.permute.xlu0 %2527  ;;  %2822 = vrot.lane.b32.xlu1 %v2821_v15, %s3284_s6 }
  0x99   : > { %2817 = vrot.lane.b32.xlu0 %v4005_v0, %s3283_s5  ;;  %v4155_v11 = vpop.permute.xlu1 %2542  ;;  %v5609_v0 = vpack.i.bf16 %v3961_v62, %v3675_v54  ;;  %v2300_v54 = vld [vmem:[%s3362_s27 + $0x98] sm:$0xff]  ;;  %v2301_v62 = vld [vmem:[%s3362_s27 + $0xa0] sm:$0xf] }
  0x9a   : > { %v1362_v58 = vrot.slane %v2300_v54, 2  ;;  %v1364_v53 = vrot.slane %v2301_v62, 2  ;;  %v1538_v17 = vrot.slane %v2300_v54, 4  ;;  %v2866_v30 = vpack.i.bf16 %v2300_v54, %v2299_v50 }
  0x9b   : > { %v4157_v60 = vpop.permute.xlu0 %2532  ;;  %2832 = vrot.lane.b32.xlu1 %v5607_v28, %s3285_s7  ;;  %v1540_v5 = vrot.slane %v2301_v62, 4  ;;  %v1369_v54 = vrot.slane %v2304_v25, 2  ;;  %v2545_v10 = vunpack.i.h.bf16 %v4155_v11 }
  0x9c   : > { %5606 = vst [vmem:[#allocation7_spill] sm:$0xff] %v4157_v60  ;;  %v1363_v1 = vsel %vm357_vm0, %v1361_v26, %v1362_v58  ;;  %v1365_v4 = vsel %vm357_vm0, %v1362_v58, %v1364_v53 }
  0x9d   : > { %2827 = vrot.lane.b32.xlu0 %v5608_v34, %s3284_s6  ;;  %v4167_v59 = vpop.permute.xlu1 %2552  ;;  %v2876_v28 = vpack.i.bf16 %v1365_v4, %v1363_v1  ;;  %v2326_v34 = vld [vmem:[%s3362_s27 + $0x168] sm:$0xff]  ;;  %v1541_v37 = vsel %vm534_vm1, %v1538_v17, %v1540_v5  ;;  %v4259_v4 = vsel %vm357_vm0, %v1366_v8, %v1367_v13  ;;  %v4262_v5 = vsel %vm357_vm0, %v1367_v13, %v1369_v54 }
  0x9e   : > { %v1582_v58 = vrot.slane %v2326_v34, 4  ;;  %v4284_v13 = vsel %vm534_vm1, %v1543_v3, %v1545_v52 }
  0x9f   : > { %v4169_v15 = vpop.permute.xlu0 %2547  ;;  %2842 = vrot.lane.b32.xlu1 %v5609_v0, %s3281_s3  ;;  %v2328_v0 = vld [vmem:[%s3362_s27 + $0x178] sm:$0xf] }
  0xa0   : > { %v1409_v26 = vrot.slane %v2328_v0, 2  ;;  %v2549_v9 = vunpack.i.l.bf16 %v4169_v15 }
  0xa1   : > { %2837 = vrot.lane.b32.xlu0 %v2836_v55, %s3285_s7  ;;  %v4179_v38 = vpop.permute.xlu1 %2562 }
  0xa3   : > { %v4181_v22 = vpop.permute.xlu0 %2557  ;;  %2852 = vrot.lane.b32.xlu1 %v5610_v63, %s3282_s4  ;;  %v1539_v63 = vsel %vm534_vm1, %v1537_v41, %v1538_v17  ;;  %v4248_v17 = vld [vmem:[%s3362_s27 + $0x150] sm:$0xff]  ;;  %v2283_v41 = vld [vmem:[%s3362_s27 + $0x160] sm:$0xf] }
  0xa4   : > { %v2886_v27 = vpack.i.bf16 %v1541_v37, %v1539_v63  ;;  %v915_v63 = vrot.slane %v4248_v17, 2  ;;  %v918_v54 = vrot.slane %v2283_v41, 2  ;;  %v1094_v47 = vrot.slane %v2283_v41, 4  ;;  %v4333_v41 = vld [vmem:[%s3362_s27 + $0x180] sm:$0xff] }
  0xa5   : > { %2847 = vrot.lane.b32.xlu0 %v5613_v57, %s3281_s3  ;;  %v4196_v55 = vpop.permute.xlu1 %2572  ;;  %v1406_v57 = vrot.slane %v2326_v34, 2 }
  0xa6   : > { %5614 = vst [vmem:[#allocation8_spill] sm:$0xff] %v4196_v55 }
  0xa7   : > { %v4198_v12 = vpop.permute.xlu0 %2567  ;;  %2862 = vrot.lane.b32.xlu1 %v2861_v49, %s3283_s5  ;;  %v1542_v49 = vrot.slane %v4219_v45, 4 }
  0xa9   : > { %2857 = vrot.lane.b32.xlu0 %v2856_v23, %s3282_s4  ;;  %v4205_v44 = vpop.permute.xlu1 %2582  ;;  %v2327_v23 = vld [vmem:[%s3362_s27 + $0x170] sm:$0xff]  ;;  %v4265_v25 = vsel %vm534_vm1, %v1542_v49, %v1543_v3  ;;  %v2544_v3 = vunpack.i.l.bf16 %v4155_v11  ;;  %v878_v11 = vrot.slane %v4068_v14, 2  ;;  %v2554_v14 = vunpack.i.l.bf16 %v4167_v59 }
  0xaa   : > { %v4240_v50 = vrot.slane %v2327_v23, 2  ;;  %v4242_v62 = vrot.slane %v2327_v23, 4 }
  0xab   : > { %v4209_v35 = vpop.permute.xlu0 %2577  ;;  %2872 = vrot.lane.b32.xlu1 %v2871_v7, %s3284_s6 }
  0xac   : > { %5615 = vst [vmem:[#allocation28_spill] sm:$0xff] %v4209_v35 }
  0xad   : > { %2867 = vrot.lane.b32.xlu0 %v2866_v30, %s3283_s5  ;;  %v4224_v46 = vpop.permute.xlu1 %2592  ;;  %v4251_v30 = vld [vmem:[%s3362_s27 + $0x158] sm:$0xff] }
  0xae   : > { %v916_v49 = vrot.slane %v4251_v30, 2 }
  0xaf   : > { %v4232_v7 = vpop.permute.xlu0 %2587  ;;  %2882 = vrot.lane.b32.xlu1 %v2881_v32, %s3285_s7  ;;  %v1585_v32 = vrot.slane %v2328_v0, 4  ;;  %v4273_v0 = vsel %vm357_vm0, %v4240_v50, %v1409_v26  ;;  %v1091_v26 = vrot.slane %v4248_v17, 4 }
  0xb0   : > { %v4326_v19 = vsel %vm357_vm0, %v916_v49, %v918_v54 }
  0xb1   : > { %2877 = vrot.lane.b32.xlu0 %v2876_v28, %s3284_s6  ;;  %v4245_v53 = vpop.permute.xlu1 %2602  ;;  %v4269_v28 = vsel %vm357_vm0, %v1406_v57, %v4240_v50  ;;  %v4288_v8 = vsel %vm534_vm1, %v4242_v62, %v1585_v32  ;;  %v2921_v57 = vpack.i.bf16 %v4216_v29, %v4219_v45  ;;  %v4323_v32 = vsel %vm357_vm0, %v915_v63, %v916_v49  ;;  %v3167_v63 = vld [vmem:[%s3362_s27 + $0x48] sm:$0xff] }
  0xb2   : > { %v1710_v29 = vsel %vm1703_vm2, %v3167_v63, %v2544_v3  ;;  %v2555_v49 = vunpack.i.h.bf16 %v4167_v59  ;;  %v2564_v63 = vunpack.i.l.bf16 %v4179_v38 }
  0xb3   : > { %v4254_v1 = vpop.permute.xlu0 %2597  ;;  %2892 = vrot.lane.b32.xlu1 %v4133_v56, %s3280_s30  ;;  %v4277_v56 = vsel %vm534_vm1, %v1582_v58, %v4242_v62  ;;  %v4293_v58 = vpack.i.bf16 %v2327_v23, %v2326_v34  ;;  %v4310_v23 = vld [vmem:[%s3362_s27 + $0x188] sm:$0xff] }
  0xb4   : > { %v4336_v39 = vrot.slane %v4310_v23, 2  ;;  %v4363_v59 = vrot.slane %v4310_v23, 4 }
  0xb5   : > { %2887 = vrot.lane.b32.xlu0 %v2886_v27, %s3285_s7  ;;  %v4281_v37 = vpop.permute.xlu1 %2612  ;;  %v1092_v27 = vrot.slane %v4251_v30, 4 }
  0xb6   : > { %5616 = vst [vmem:[#allocation33_spill] sm:$0xff] %v4281_v37 }
  0xb7   : > { %v4299_v52 = vpop.permute.xlu0 %2607  ;;  %2902 = vrot.lane.b32.xlu1 %v2901_v2, %s3281_s3  ;;  %v4330_v48 = vsel %vm534_vm1, %v1091_v26, %v1092_v27  ;;  %v4351_v26 = vld [vmem:[%s3362_s27 + $0x190] sm:$0xf]  ;;  %v4360_v3 = vsel %vm534_vm1, %v1092_v27, %v1094_v47  ;;  %v1411_v27 = vrot.slane %v4333_v41, 2 }
  0xb9   : > { %2897 = vrot.lane.b32.xlu0 %v2896_v42, %s3281_s3  ;;  %v2623_v2 = vpop.permute.xlu1 %2622  ;;  %v1711_v42 = vsel %vm1703_vm2, %v3166_v31, %v2545_v10  ;;  %v2550_v31 = vunpack.i.h.bf16 %v4169_v15  ;;  %v1414_v15 = vrot.slane %v4351_v26, 2 }
  0xba   : > { %v2625_v34 = vunpack.i.h.bf16 %v2623_v2  ;;  %v2624_v45 = vunpack.i.l.bf16 %v2623_v2 }
  0xbb   : > { %v4344_v54 = vpop.permute.xlu0 %2617  ;;  %2912 = vrot.lane.b32.xlu1 %v2911_v43, %s3282_s4  ;;  %v5618_v43 = vld [vmem:[#allocation14_spill] sm:$0xff] }
  0xbc   : > { %5617 = vst [vmem:[#allocation9_spill] sm:$0xff] %v4344_v54  ;;  %v4354_v2 = vsel %vm1736_vm3, %v1711_v42, %v2625_v34  ;;  %v4357_v10 = vsel %vm1736_vm3, %v1710_v29, %v2624_v45  ;;  %v4373_v29 = vsel %vm357_vm0, %v5618_v43, %v878_v11  ;;  %v3168_v42 = vld [vmem:[%s3362_s27 + $0x80] sm:$0xff]  ;;  %v2565_v11 = vunpack.i.h.bf16 %v4179_v38 }
  0xbd   : > { %2907 = vrot.lane.b32.xlu0 %v2906_v21, %s3282_s4  ;;  %v2633_v36 = vpop.permute.xlu1 %2632  ;;  %v1715_v33 = vsel %vm1703_vm2, %v3168_v42, %v2555_v49  ;;  %v1714_v21 = vsel %vm1703_vm2, %v3169_v16, %v2554_v14  ;;  %v4392_v42 = vld [vmem:[%s3362_s27 + $0xc8] sm:$0xff]  ;;  %v3171_v38 = vld [vmem:[%s3362_s27 + $0x60] sm:$0xff] }
  0xbe   : > { %v2635_v45 = vunpack.i.h.bf16 %v2633_v36  ;;  %v2634_v34 = vunpack.i.l.bf16 %v2633_v36  ;;  %v3170_v14 = vld [vmem:[%s3362_s27 + $0x68] sm:$0xff]  ;;  %v1712_v35 = vsel %vm1703_vm2, %v3171_v38, %v2549_v9  ;;  %v3172_v9 = vld [vmem:[%s3362_s27 + $0xb0] sm:$0xff] }
  0xbf   : > { %v2628_v43 = vpop.permute.xlu0 %2627  ;;  %2922 = vrot.lane.b32.xlu1 %v2921_v57, %s3283_s5  ;;  %v1713_v16 = vsel %vm1703_vm2, %v3170_v14, %v2550_v31  ;;  %v2560_v57 = vunpack.i.h.bf16 %v4181_v22  ;;  %v4409_v14 = vld [vmem:[%s3362_s27 + $0xc0] sm:$0xff]  ;;  %v1719_v38 = vsel %vm1703_vm2, %v3172_v9, %v2565_v11  ;;  %v3174_v9 = vld [vmem:[%s3362_s27 + $0x98] sm:$0xff] }
  0xc0   : > { %v4386_v36 = vsel %vm1736_vm3, %v1715_v33, %v2635_v45  ;;  %v4389_v47 = vsel %vm1736_vm3, %v1714_v21, %v2634_v34  ;;  %v2630_v54 = vunpack.i.h.bf16 %v2628_v43  ;;  %v2629_v49 = vunpack.i.l.bf16 %v2628_v43 }
  0xc1   : > { %v2559_v45 = vunpack.i.l.bf16 %v4181_v22  ;;  %2917 = vrot.lane.b32.xlu0 %v4293_v58, %s3283_s5  ;;  %v2643_v34 = vpop.permute.xlu1 %2642  ;;  %v3173_v22 = vld [vmem:[%s3362_s27 + $0xa8] sm:$0xff] }
  0xc2   : > { %v4403_v33 = vsel %vm1736_vm3, %v1712_v35, %v2629_v49  ;;  %v4406_v21 = vsel %vm1736_vm3, %v1713_v16, %v2630_v54  ;;  %v2645_v43 = vunpack.i.h.bf16 %v2643_v34  ;;  %v2644_v31 = vunpack.i.l.bf16 %v2643_v34 }
  0xc3   : > { %v1718_v37 = vsel %vm1703_vm2, %v3173_v22, %v2564_v63  ;;  %v2638_v55 = vpop.permute.xlu0 %2637  ;;  %v5619_v35 = vpack.i.bf16 %v4262_v5, %v4259_v4  ;;  %v4421_v54 = vsel %vm357_vm0, %v1411_v27, %v4336_v39  ;;  %v1372_v49 = vrot.slane %v4392_v42, 2  ;;  %v3175_v4 = vld [vmem:[%s3362_s27 + $0x90] sm:$0xff] }
  0xc4   : > { %v4425_v16 = vsel %vm1736_vm3, %v1719_v38, %v2645_v43  ;;  %v4428_v11 = vsel %vm1736_vm3, %v1718_v37, %v2644_v31  ;;  %v2640_v63 = vunpack.i.h.bf16 %v2638_v55  ;;  %v2639_v34 = vunpack.i.l.bf16 %v2638_v55 }
  0xc5   : > { %2932 = vrot.lane.b32.xlu1 %v5619_v35, %s3284_s6  ;;  %v1717_v22 = vsel %vm1703_vm2, %v3174_v9, %v2560_v57  ;;  %v1716_v5 = vsel %vm1703_vm2, %v3175_v4, %v2559_v45  ;;  %v5620_v27 = vpack.i.bf16 %v4273_v0, %v4269_v28  ;;  %v4438_v35 = vpop.permute.xlu1 %2652  ;;  %v1548_v43 = vrot.slane %v4392_v42, 4  ;;  %v2307_v0 = vld [vmem:[%s3362_s27 + $0xd0] sm:$0xf] }
  0xc6   : > { %5621 = vst [vmem:[#allocation11_spill] sm:$0xff] %v4438_v35  ;;  %v1371_v37 = vrot.slane %v4409_v14, 2  ;;  %v4443_v31 = vsel %vm1736_vm3, %v1716_v5, %v2639_v34  ;;  %v4446_v55 = vsel %vm1736_vm3, %v1717_v22, %v2640_v63  ;;  %v4450_v57 = vsel %vm357_vm0, %v4336_v39, %v1414_v15  ;;  %v5623_v5 = vld [vmem:[#allocation16_spill] sm:$0xff] }
  0xc7   : > { %2927 = vrot.lane.b32.xlu0 %v5620_v27, %s3284_s6  ;;  %v1547_v45 = vrot.slane %v4409_v14, 4  ;;  %v2585_v38 = vunpack.i.h.bf16 %v4205_v44  ;;  %v2584_v9 = vunpack.i.l.bf16 %v4205_v44  ;;  %v4456_v4 = vpop.permute.xlu0 %2647  ;;  %v5622_v34 = vpack.i.bf16 %v4284_v13, %v4265_v25 }
  0xc8   : > { %v2951_v63 = vpack.i.bf16 %v4326_v19, %v4323_v32  ;;  %v4466_v15 = vpack.i.bf16 %v4310_v23, %v4333_v41  ;;  %v2961_v22 = vpack.i.bf16 %v4360_v3, %v4330_v48  ;;  %v2956_v44 = vpack.i.bf16 %v4373_v29, %v5623_v5  ;;  %v3177_v23 = vld [vmem:[%s3362_s27 + $0x108] sm:$0xff] }
  0xc9   : > { %2942 = vrot.lane.b32.xlu1 %v5622_v34, %s3285_s7  ;;  %v1590_v25 = vrot.slane %v4351_v26, 4  ;;  %v5624_v19 = vpack.i.bf16 %v4288_v8, %v4277_v56  ;;  %v2663_v13 = vpop.permute.xlu1 %2662  ;;  %v5625_v48 = vrot.slane %v4333_v41, 4  ;;  %v4488_v3 = vsel %vm357_vm0, %v1371_v37, %v1372_v49  ;;  %v4503_v37 = vld [vmem:[%s3362_s27 + $0x178] sm:$0xf] }
  0xca   : > { %v1374_v26 = vrot.slane %v2307_v0, 2  ;;  %v2665_v29 = vunpack.i.h.bf16 %v2663_v13  ;;  %v2664_v34 = vunpack.i.l.bf16 %v2663_v13  ;;  %v4491_v8 = vsel %vm534_vm1, %v1547_v45, %v1548_v43 }
  0xcb   : > { %2937 = vrot.lane.b32.xlu0 %v5624_v19, %s3285_s7  ;;  %v4485_v32 = vsel %vm534_vm1, %v5625_v48, %v4363_v59  ;;  %v1550_v5 = vrot.slane %v2307_v0, 4  ;;  %v3176_v19 = vld [vmem:[%s3362_s27 + $0x110] sm:$0xff]  ;;  %v1726_v41 = vsel %vm1703_vm2, %v3177_v23, %v2584_v9  ;;  %v2595_v35 = vunpack.i.h.bf16 %v4224_v46  ;;  %v4499_v60 = vpop.permute.xlu0 %2657 }
  0xcc   : > { %v1727_v27 = vsel %vm1703_vm2, %v3176_v19, %v2585_v38  ;;  %v2594_v48 = vunpack.i.l.bf16 %v4224_v46  ;;  %v4509_v0 = vsel %vm1736_vm3, %v1726_v41, %v2664_v34  ;;  %v4513_v38 = vsel %vm534_vm1, %v4363_v59, %v1590_v25  ;;  %v3178_v19 = vld [vmem:[%s3362_s27 + $0x140] sm:$0xff] }
  0xcd   : > { %2952 = vrot.lane.b32.xlu1 %v2951_v63, %s3281_s3  ;;  %v4506_v45 = vsel %vm1736_vm3, %v1727_v27, %v2665_v29  ;;  %5627 = vst [vmem:[#allocation29_spill] sm:$0xff] %v4509_v0  ;;  %v2590_v46 = vunpack.i.h.bf16 %v4232_v7  ;;  %v2589_v9 = vunpack.i.l.bf16 %v4232_v7  ;;  %v5628_v63 = vpack.i.bf16 %v4251_v30, %v4248_v17  ;;  %v2673_v13 = vpop.permute.xlu1 %2672  ;;  %v3179_v17 = vld [vmem:[%s3362_s27 + $0x138] sm:$0xff] }
  0xce   : > { %5626 = vst [vmem:[#allocation24_spill] sm:$0xff] %v4506_v45  ;;  %v4522_v27 = vsel %vm357_vm0, %v1372_v49, %v1374_v26  ;;  %v883_v23 = vrot.slane %v4085_v18, 2  ;;  %v2675_v29 = vunpack.i.h.bf16 %v2673_v13  ;;  %v2674_v34 = vunpack.i.l.bf16 %v2673_v13  ;;  %v3180_v13 = vld [vmem:[%s3362_s27 + $0x128] sm:$0xff] }
  0xcf   : > { %2947 = vrot.lane.b32.xlu0 %v5628_v63, %s3280_s30  ;;  %v4526_v25 = vsel %vm534_vm1, %v1548_v43, %v1550_v5  ;;  %v923_v7 = vrot.slane %v4503_v37, 2  ;;  %v1731_v41 = vsel %vm1703_vm2, %v3178_v19, %v2595_v35  ;;  %v1730_v30 = vsel %vm1703_vm2, %v3179_v17, %v2594_v48  ;;  %v2668_v18 = vpop.permute.xlu0 %2667  ;;  %v3181_v19 = vld [vmem:[%s3362_s27 + $0x120] sm:$0xff]  ;;  %v3188_v45 = vld [vmem:[%s3362_s27 + $0xc8] sm:$0xff] }
  0xd0   : > { %v2605_v49 = vunpack.i.h.bf16 %v4245_v53  ;;  %v2604_v26 = vunpack.i.l.bf16 %v4245_v53  ;;  %v4537_v63 = vsel %vm1736_vm3, %v1731_v41, %v2675_v29  ;;  %v4540_v43 = vsel %vm1736_vm3, %v1730_v30, %v2674_v34 }
  0xd1   : > { %2962 = vrot.lane.b32.xlu1 %v2961_v22, %s3282_s4  ;;  %5629 = vst [vmem:[#allocation47_spill] sm:$0xff] %v4537_v63  ;;  %5630 = vst [vmem:[#allocation38_spill] sm:$0xff] %v4540_v43  ;;  %v2670_v5 = vunpack.i.h.bf16 %v2668_v18  ;;  %v2669_v35 = vunpack.i.l.bf16 %v2668_v18  ;;  %v1729_v48 = vsel %vm1703_vm2, %v3180_v13, %v2590_v46  ;;  %v1728_v17 = vsel %vm1703_vm2, %v3181_v19, %v2589_v9  ;;  %v2683_v29 = vpop.permute.xlu1 %2682  ;;  %v3182_v18 = vld [vmem:[%s3362_s27 + $0x170] sm:$0xff]  ;;  %v3183_v13 = vld [vmem:[%s3362_s27 + $0x168] sm:$0xff] }
  0xd2   : > { %v2600_v53 = vunpack.i.h.bf16 %v4254_v1  ;;  %v2599_v22 = vunpack.i.l.bf16 %v4254_v1  ;;  %v2685_v30 = vunpack.i.h.bf16 %v2683_v29  ;;  %v2684_v46 = vunpack.i.l.bf16 %v2683_v29  ;;  %v4573_v29 = vld [vmem:[%s3362_s27 + $0xe0] sm:$0xff] }
  0xd3   : > { %2957 = vrot.lane.b32.xlu0 %v2956_v44, %s3281_s3  ;;  %v4550_v41 = vsel %vm1736_vm3, %v1728_v17, %v2669_v35  ;;  %v4553_v34 = vsel %vm1736_vm3, %v1729_v48, %v2670_v5  ;;  %v1735_v9 = vsel %vm1703_vm2, %v3182_v18, %v2605_v49  ;;  %v1734_v1 = vsel %vm1703_vm2, %v3183_v13, %v2604_v26  ;;  %v2678_v19 = vpop.permute.xlu0 %2677  ;;  %v5633_v44 = vld [vmem:[#allocation13_spill] sm:$0xff]  ;;  %v3184_v18 = vld [vmem:[%s3362_s27 + $0x158] sm:$0xff]  ;;  %v3185_v13 = vld [vmem:[%s3362_s27 + $0x150] sm:$0xff] }
  0xd4   : > { %5631 = vst [vmem:[#allocation41_spill] sm:$0xff] %v4550_v41  ;;  %5632 = vst [vmem:[#allocation34_spill] sm:$0xff] %v4553_v34  ;;  %v4563_v5 = vsel %vm357_vm0, %v5633_v44, %v883_v23  ;;  %v1099_v35 = vrot.slane %v4503_v37, 4  ;;  %v4567_v48 = vsel %vm1736_vm3, %v1735_v9, %v2685_v30  ;;  %v4570_v49 = vsel %vm1736_vm3, %v1734_v1, %v2684_v46  ;;  %v4590_v1 = vld [vmem:[%s3362_s27 + $0xd8] sm:$0xff] }
  0xd5   : > { %2972 = vrot.lane.b32.xlu1 %v4466_v15, %s3283_s5  ;;  %5634 = vst [vmem:[#allocation26_spill] sm:$0xff] %v4567_v48  ;;  %5635 = vst [vmem:[#allocation30_spill] sm:$0xff] %v4570_v49  ;;  %v2680_v26 = vunpack.i.h.bf16 %v2678_v19  ;;  %v2679_v17 = vunpack.i.l.bf16 %v2678_v19  ;;  %v1733_v23 = vsel %vm1703_vm2, %v3184_v18, %v2600_v53  ;;  %v1732_v44 = vsel %vm1703_vm2, %v3185_v13, %v2599_v22  ;;  %v4583_v30 = vpop.permute.xlu1 %2692  ;;  %v2333_v19 = vld [vmem:[%s3362_s27 + $0x1a0] sm:$0xff]  ;;  %v2310_v53 = vld [vmem:[%s3362_s27 + $0xe8] sm:$0xf] }
  0xd6   : > { %v5636_v37 = vpack.i.bf16 %v4079_v40, %v5580_v6  ;;  %v2991_v46 = vpack.i.bf16 %v4513_v38, %v4485_v32  ;;  %v2986_v9 = vpack.i.bf16 %v4522_v27, %v4488_v3  ;;  %v2996_v40 = vpack.i.bf16 %v4526_v25, %v4491_v8  ;;  %v5639_v6 = vld [vmem:[#allocation15_spill] sm:$0xff]  ;;  %v2332_v13 = vld [vmem:[%s3362_s27 + $0x198] sm:$0xff] }
  0xd7   : > { %v4595_v18 = vsel %vm1736_vm3, %v1732_v44, %v2679_v17  ;;  %v4598_v22 = vsel %vm1736_vm3, %v1733_v23, %v2680_v26  ;;  %v4606_v3 = vpop.permute.xlu0 %2687  ;;  %v5640_v27 = vpack.i.bf16 %v4450_v57, %v4421_v54  ;;  %v4614_v17 = vsel %vm357_vm0, %v4240_v50, %v923_v7 }
  0xd8   : > { %2967 = vrot.lane.b32.xlu0 %v5636_v37, %s3282_s4  ;;  %5637 = vst [vmem:[#allocation6_spill] sm:$0xff] %v4595_v18  ;;  %5638 = vst [vmem:[#allocation36_spill] sm:$0xff] %v4598_v22  ;;  %v2334_v37 = vld [vmem:[%s3362_s27 + $0x1a8] sm:$0xf]  ;;  %v4618_v26 = vsel %vm534_vm1, %v4242_v62, %v1099_v35  ;;  %v1377_v8 = vrot.slane %v4573_v29, 2  ;;  %v1553_v25 = vrot.slane %v4573_v29, 4  ;;  %v5641_v50 = vpack.i.bf16 %v4392_v42, %v4409_v14 }
  0xd9   : > { %2982 = vrot.lane.b32.xlu1 %v5640_v27, %s3284_s6  ;;  %v1376_v23 = vrot.slane %v4590_v1, 2  ;;  %v1552_v44 = vrot.slane %v4590_v1, 4  ;;  %v4624_v38 = vrot.slane %v2333_v19, 2  ;;  %v1379_v57 = vrot.slane %v2310_v53, 2  ;;  %v2289_v27 = vld [vmem:[%s3362_s27 + $0x190] sm:$0xf]  ;;  %v2703_v7 = vpop.permute.xlu1 %2702 }
  0xda   : > { %v4631_v62 = vrot.slane %v2333_v19, 4  ;;  %v1416_v35 = vrot.slane %v2332_v13, 2  ;;  %v1592_v48 = vrot.slane %v2332_v13, 4  ;;  %v1419_v49 = vrot.slane %v2334_v37, 2  ;;  %v4768_v14 = vld [vmem:[%s3362_s27 + $0x1a8] sm:$0xf] }
  0xdb   : > { %v2705_v22 = vunpack.i.h.bf16 %v2703_v7  ;;  %v2704_v18 = vunpack.i.l.bf16 %v2703_v7  ;;  %v1555_v63 = vrot.slane %v2310_v53, 4  ;;  %v1595_v43 = vrot.slane %v2334_v37, 4  ;;  %v4633_v34 = vpop.permute.xlu0 %2697 }
  0xdc   : > { %2977 = vrot.lane.b32.xlu0 %v5641_v50, %s3283_s5  ;;  %5642 = vst [vmem:[#allocation37_spill] sm:$0xff] %v4633_v34  ;;  %v3006_v41 = vpack.i.bf16 %v4614_v17, %v4269_v28  ;;  %v928_v50 = vrot.slane %v2289_v27, 2  ;;  %v4654_v28 = vsel %vm357_vm0, %v1377_v8, %v1379_v57  ;;  %v4659_v17 = vsel %vm357_vm0, %v1416_v35, %v4624_v38  ;;  %v2265_v57 = vld [vmem:[%s3362_s27 + $0xd0] sm:$0xf] }
  0xdd   : > { %2992 = vrot.lane.b32.xlu1 %v2991_v46, %s3285_s7  ;;  %v4644_v7 = vsel %vm1769_vm4, %v4357_v10, %v2704_v18  ;;  %v4648_v53 = vsel %vm1769_vm4, %v4354_v2, %v2705_v22  ;;  %v4651_v46 = vsel %vm357_vm0, %v1376_v23, %v1377_v8  ;;  %v2713_v37 = vpop.permute.xlu1 %2712  ;;  %v4663_v10 = vsel %vm357_vm0, %v4624_v38, %v1419_v49 }
  0xde   : > { %5643 = vst [vmem:[#allocation40_spill] sm:$0xff] %v4644_v7  ;;  %5644 = vst [vmem:[#allocation5_spill] sm:$0xff] %v4648_v53  ;;  %v4666_v2 = vsel %vm534_vm1, %v1552_v44, %v1553_v25  ;;  %v4670_v18 = vsel %vm534_vm1, %v1592_v48, %v4631_v62  ;;  %v2715_v22 = vunpack.i.h.bf16 %v2713_v37  ;;  %v2714_v8 = vunpack.i.l.bf16 %v2713_v37  ;;  %v2268_v48 = vld [vmem:[%s3362_s27 + $0xe8] sm:$0xf] }
  0xdf   : > { %v4677_v23 = vsel %vm534_vm1, %v4631_v62, %v1595_v43  ;;  %v2708_v35 = vpop.permute.xlu0 %2707  ;;  %v4682_v49 = vpack.i.bf16 %v2333_v19, %v2332_v13  ;;  %v4688_v44 = vsel %vm357_vm0, %v4336_v39, %v928_v50  ;;  %v5649_v50 = vpack.i.bf16 %v4563_v5, %v5639_v6 }
  0xe0   : > { %2987 = vrot.lane.b32.xlu0 %v2986_v9, %s3284_s6  ;;  %v4673_v9 = vsel %vm534_vm1, %v1553_v25, %v1555_v63  ;;  %v1104_v63 = vrot.slane %v2289_v27, 4  ;;  %v4692_v43 = vsel %vm1769_vm4, %v4389_v47, %v2714_v8  ;;  %v4696_v25 = vsel %vm1769_vm4, %v4386_v36, %v2715_v22  ;;  %v4714_v8 = vld [vmem:[%s3362_s27 + $0x1b0] sm:$0xff] }
  0xe1   : > { %3002 = vrot.lane.b32.xlu1 %v4293_v58, %s3280_s30  ;;  %5645 = vst [vmem:[#allocation27_spill] sm:$0xff] %v4692_v43  ;;  %5646 = vst [vmem:[#allocation44_spill] sm:$0xff] %v4696_v25  ;;  %v2710_v58 = vunpack.i.h.bf16 %v2708_v35  ;;  %v2709_v19 = vunpack.i.l.bf16 %v2708_v35  ;;  %v2723_v13 = vpop.permute.xlu1 %2722  ;;  %v888_v47 = vrot.slane %v2265_v57, 2  ;;  %v4717_v35 = vld [vmem:[%s3362_s27 + $0x1b8] sm:$0xff]  ;;  %v5657_v25 = vpack.i.bf16 %v4618_v26, %v4277_v56  ;;  %v5661_v26 = vld [vmem:[#allocation45_spill] sm:$0xff] }
  0xe2   : > { %v2725_v37 = vunpack.i.h.bf16 %v2723_v13  ;;  %v2724_v22 = vunpack.i.l.bf16 %v2723_v13  ;;  %v1069_v53 = vrot.slane %v2268_v48, 4  ;;  %v5660_v56 = vpack.i.bf16 %v4573_v29, %v4590_v1 }
  0xe3   : > { %v4707_v36 = vsel %vm1769_vm4, %v4403_v33, %v2709_v19  ;;  %v2718_v27 = vpop.permute.xlu0 %2717  ;;  %v4739_v33 = vld [vmem:[%s3362_s27 + $0xf8] sm:$0xff] }
  0xe4   : > { %2997 = vrot.lane.b32.xlu0 %v2996_v40, %s3285_s7  ;;  %5647 = vst [vmem:[#allocation10_spill] sm:$0xff] %v4707_v36  ;;  %v4711_v40 = vsel %vm1769_vm4, %v4406_v21, %v2710_v58  ;;  %v4727_v21 = vsel %vm534_vm1, %v4363_v59, %v1104_v63  ;;  %v1064_v58 = vrot.slane %v2265_v57, 4  ;;  %v4731_v19 = vsel %vm1769_vm4, %v4428_v11, %v2724_v22  ;;  %v5652_v57 = vld [vmem:[#allocation18_spill] sm:$0xff]  ;;  %v2313_v22 = vld [vmem:[%s3362_s27 + $0x100] sm:$0xf] }
  0xe5   : > { %5648 = vst [vmem:[#allocation25_spill] sm:$0xff] %v4711_v40  ;;  %3012 = vrot.lane.b32.xlu1 %v5649_v50, %s3281_s3  ;;  %5650 = vst [vmem:[#allocation46_spill] sm:$0xff] %v4731_v19  ;;  %v4735_v13 = vsel %vm1769_vm4, %v4425_v16, %v2725_v37  ;;  %v2720_v5 = vunpack.i.h.bf16 %v2718_v27  ;;  %v2719_v6 = vunpack.i.l.bf16 %v2718_v27  ;;  %v2337_v50 = vld [vmem:[%s3362_s27 + $0x1c0] sm:$0xf]  ;;  %v4742_v59 = vpop.permute.xlu1 %2732  ;;  %v4746_v63 = vsel %vm357_vm0, %v5652_v57, %v888_v47  ;;  %v4753_v27 = vld [vmem:[%s3362_s27 + $0xf0] sm:$0xff] }
  0xe6   : > { %5651 = vst [vmem:[#allocation12_spill] sm:$0xff] %v4735_v13  ;;  %v1422_v11 = vrot.slane %v4717_v35, 2  ;;  %v1598_v16 = vrot.slane %v4717_v35, 4  ;;  %v1421_v47 = vrot.slane %v4714_v8, 2  ;;  %v1597_v57 = vrot.slane %v4714_v8, 4  ;;  %v5658_v40 = vld [vmem:[#allocation21_spill] sm:$0xff] }
  0xe7   : > { %v4758_v39 = vsel %vm1769_vm4, %v4443_v31, %v2719_v6  ;;  %v4770_v42 = vpop.permute.xlu0 %2727  ;;  %v5655_v37 = vpack.i.bf16 %v4099_v61, %v5588_v24  ;;  %v5656_v31 = vld [vmem:[#allocation42_spill] sm:$0xff]  ;;  %v1558_v13 = vrot.slane %v4739_v33, 4  ;;  %v1381_v19 = vrot.slane %v4753_v27, 2 }
  0xe8   : > { %3007 = vrot.lane.b32.xlu0 %v3006_v41, %s3281_s3  ;;  %5653 = vst [vmem:[#allocation20_spill] sm:$0xff] %v4758_v39  ;;  %v4762_v41 = vsel %vm1769_vm4, %v4446_v55, %v2720_v5  ;;  %v4778_v6 = vsel %vm534_vm1, %v5656_v31, %v1064_v58  ;;  %v1424_v55 = vrot.slane %v2337_v50, 2  ;;  %v1382_v5 = vrot.slane %v4739_v33, 2 }
  0xe9   : > { %5654 = vst [vmem:[#allocation23_spill] sm:$0xff] %v4762_v41  ;;  %3022 = vrot.lane.b32.xlu1 %v5655_v37, %s3282_s4  ;;  %v1557_v41 = vrot.slane %v4753_v27, 4  ;;  %v1600_v39 = vrot.slane %v2337_v50, 4  ;;  %v4788_v61 = vpop.permute.xlu1 %2742  ;;  %v1384_v24 = vrot.slane %v2313_v22, 2  ;;  %v1560_v58 = vrot.slane %v2313_v22, 4 }
  0xea   : > { %v893_v37 = vrot.slane %v2268_v48, 2  ;;  %v933_v31 = vrot.slane %v4768_v14, 2  ;;  %v4796_v50 = vsel %vm357_vm0, %v1421_v47, %v1422_v11  ;;  %v4807_v22 = vsel %vm357_vm0, %v1422_v11, %v1424_v55  ;;  %v5663_v55 = vld [vmem:[#allocation39_spill] sm:$0xff] }
  0xeb   : > { %v4798_v7 = vpop.permute.xlu0 %2737  ;;  %v4812_v47 = vsel %vm534_vm1, %v1597_v57, %v1598_v16  ;;  %v4815_v48 = vsel %vm534_vm1, %v1598_v16, %v1600_v39  ;;  %v4818_v43 = vsel %vm357_vm0, %v1381_v19, %v1382_v5  ;;  %v4821_v29 = vsel %vm534_vm1, %v1557_v41, %v1558_v13  ;;  %v5662_v39 = vld [vmem:[#allocation17_spill] sm:$0xff] }
  0xec   : > { %3017 = vrot.lane.b32.xlu0 %v5657_v25, %s3282_s4  ;;  %5659 = vst [vmem:[#allocation22_spill] sm:$0xff] %v4798_v7  ;;  %v4828_v11 = vsel %vm357_vm0, %v1382_v5, %v1384_v24  ;;  %v4831_v57 = vsel %vm534_vm1, %v1558_v13, %v1560_v58  ;;  %v4835_v16 = vsel %vm357_vm0, %v5662_v39, %v893_v37  ;;  %v2530_v41 = vunpack.i.h.bf16 %v4147_v20 }
  0xed   : > { %3032 = vrot.lane.b32.xlu1 %v5660_v56, %s3283_s5  ;;  %v4825_v1 = vpop.permute.xlu1 %2752  ;;  %v4839_v19 = vsel %vm357_vm0, %v4624_v38, %v933_v31  ;;  %v4844_v56 = vsel %vm534_vm1, %v5663_v55, %v1069_v53  ;;  %v1109_v5 = vrot.slane %v4768_v14, 4  ;;  %v2529_v13 = vunpack.i.l.bf16 %v4147_v20  ;;  %v5667_v20 = vld [vmem:[#allocation43_spill] sm:$0xff]  ;;  %v3186_v53 = vld [vmem:[%s3362_s27 + $0x8] sm:$0xff] }
  0xee   : > { %v2570_v24 = vunpack.i.h.bf16 %v4198_v12  ;;  %v5664_v38 = vpack.i.bf16 %v4654_v28, %v4651_v46  ;;  %v2569_v14 = vunpack.i.l.bf16 %v4198_v12  ;;  %v5665_v46 = vld [vmem:[#allocation19_spill] sm:$0xff]  ;;  %v2610_v39 = vunpack.i.h.bf16 %v4299_v52 }
  0xef   : > { %v4849_v58 = vpop.permute.xlu0 %2747  ;;  %v2609_v55 = vunpack.i.l.bf16 %v4299_v52  ;;  %v5666_v12 = vpack.i.bf16 %v4663_v10, %v4659_v17  ;;  %v1705_v36 = vsel %vm1703_vm2, %v3186_v53, %v2530_v41  ;;  %v2650_v52 = vunpack.i.h.bf16 %v4456_v4  ;;  %v3189_v41 = vld [vmem:[%s3362_s27 + $0xc0] sm:$0xff] }
  0xf0   : > { %3027 = vrot.lane.b32.xlu0 %v4682_v49, %s3283_s5  ;;  %v2649_v37 = vunpack.i.l.bf16 %v4456_v4  ;;  %v4882_v10 = vsel %vm534_vm1, %v4631_v62, %v1109_v5  ;;  %v1721_v31 = vsel %vm1703_vm2, %v3188_v45, %v2570_v24  ;;  %v2730_v0 = vunpack.i.h.bf16 %v4770_v42 }
  0xf1   : > { %3042 = vrot.lane.b32.xlu1 %v5664_v38, %s3284_s6  ;;  %v2763_v38 = vpop.permute.xlu1 %2762  ;;  %v2729_v28 = vunpack.i.l.bf16 %v4770_v42  ;;  %v5668_v4 = vpack.i.bf16 %v4673_v9, %v4666_v2  ;;  %v1720_v62 = vsel %vm1703_vm2, %v3189_v41, %v2569_v14  ;;  %v2689_v5 = vunpack.i.l.bf16 %v4606_v3 }
  0xf2   : > { %v2744_v45 = vunpack.i.l.bf16 %v4788_v61  ;;  %v1738_v42 = vsel %vm1736_vm3, %v1705_v36, %v2610_v39  ;;  %v2755_v53 = vunpack.i.h.bf16 %v4825_v1  ;;  %v5669_v2 = vpack.i.bf16 %v4677_v23, %v4670_v18 }
  0xf3   : > { %v4890_v34 = vpop.permute.xlu0 %2757  ;;  %v1753_v14 = vsel %vm1736_vm3, %v1720_v62, %v2649_v37  ;;  %v2765_v41 = vunpack.i.h.bf16 %v2763_v38  ;;  %v2690_v23 = vunpack.i.h.bf16 %v4606_v3  ;;  %v2749_v62 = vunpack.i.l.bf16 %v4849_v58 }
  0xf4   : > { %3037 = vrot.lane.b32.xlu0 %v5666_v12, %s3284_s6  ;;  %v3187_v12 = vld [vmem:[%s3362_s27] sm:$0xff] }
  0xf5   : > { %v1704_v25 = vsel %vm1703_vm2, %v3187_v12, %v2529_v13  ;;  %3052 = vrot.lane.b32.xlu1 %v5668_v4, %s3285_s7  ;;  %v2745_v13 = vunpack.i.h.bf16 %v4788_v61  ;;  %v2754_v12 = vunpack.i.l.bf16 %v4825_v1  ;;  %v2773_v9 = vpop.permute.xlu1 %2772  ;;  %v1754_v4 = vsel %vm1736_vm3, %v1721_v31, %v2650_v52 }
  0xf6   : > { %v1737_v24 = vsel %vm1736_vm3, %v1704_v25, %v2609_v55  ;;  %v2764_v61 = vunpack.i.l.bf16 %v2763_v38  ;;  %v1786_v25 = vsel %vm1769_vm4, %v1753_v14, %v2729_v28  ;;  %v1787_v36 = vsel %vm1769_vm4, %v1754_v4, %v2730_v0 }
  0xf7   : > { %v2775_v39 = vunpack.i.h.bf16 %v2773_v9  ;;  %v2774_v55 = vunpack.i.l.bf16 %v2773_v9  ;;  %v2768_v7 = vpop.permute.xlu0 %2767  ;;  %v5670_v1 = vpack.i.bf16 %v4688_v44, %v4421_v54  ;;  %v1770_v37 = vsel %vm1769_vm4, %v1737_v24, %v2689_v5 }
  0xf8   : > { %3047 = vrot.lane.b32.xlu0 %v5669_v2, %s3285_s7  ;;  %v1819_v31 = vsel %vm1802_vm5, %v1786_v25, %v2744_v45  ;;  %v1820_v38 = vsel %vm1802_vm5, %v1787_v36, %v2745_v13  ;;  %v2750_v52 = vunpack.i.h.bf16 %v4849_v58  ;;  %v2760_v45 = vunpack.i.h.bf16 %v4890_v34 }
  0xf9   : > { %3062 = vrot.lane.b32.xlu1 %v5670_v1, %s3281_s3  ;;  %v1852_v28 = vsel %vm1835_vm6, %v1819_v31, %v2754_v12  ;;  %v1853_v0 = vsel %vm1835_vm6, %v1820_v38, %v2755_v53  ;;  %v2783_v54 = vpop.permute.xlu1 %2782  ;;  %v2759_v24 = vunpack.i.l.bf16 %v4890_v34  ;;  %v5671_v58 = vpack.i.bf16 %v4727_v21, %v4485_v32  ;;  %v4949_v32 = vld [vmem:[%s3362_s27 + $0x110] sm:$0xff] }
  0xfa   : > { %v1885_v3 = vsel %vm1868_vm7, %v1852_v28, %v2764_v61  ;;  %v1886_v44 = vsel %vm1868_vm7, %v1853_v0, %v2765_v41  ;;  %v2785_v5 = vunpack.i.h.bf16 %v2783_v54  ;;  %v2784_v13 = vunpack.i.l.bf16 %v2783_v54  ;;  %v4946_v41 = vld [vmem:[%s3362_s27 + $0x108] sm:$0xff]  ;;  %v4975_v0 = vld [vmem:[%s3362_s27 + $0x1d0] sm:$0xff] }
  0xfb   : > { %v2778_v53 = vpop.permute.xlu0 %2777  ;;  %v1919_v12 = vsel %vm1901_vm8, %v1886_v44, %v2775_v39  ;;  %v2770_v2 = vunpack.i.h.bf16 %v2768_v7  ;;  %v2769_v9 = vunpack.i.l.bf16 %v2768_v7  ;;  %v1771_v21 = vsel %vm1769_vm4, %v1738_v42, %v2690_v23 }
  0xfc   : > { %3057 = vrot.lane.b32.xlu0 %v4466_v15, %s3280_s30  ;;  %v1918_v15 = vsel %vm1901_vm8, %v1885_v3, %v2774_v55  ;;  %v1952_v4 = vsel %vm1934_vm9, %v1919_v12, %v2785_v5  ;;  %v2780_v61 = vunpack.i.h.bf16 %v2778_v53  ;;  %v2779_v25 = vunpack.i.l.bf16 %v2778_v53  ;;  %v5677_v53 = vld [vmem:[#allocation7_spill] sm:$0xff] }
  0xfd   : > { %3072 = vrot.lane.b32.xlu1 %v5671_v58, %s3282_s4  ;;  %v1951_v14 = vsel %vm1934_vm9, %v1918_v15, %v2784_v13  ;;  %v5674_v7 = vpack.i.bf16 %v4746_v63, %v5658_v40  ;;  %v4956_v36 = vpop.permute.xlu1 %2792  ;;  %v2540_v55 = vunpack.i.h.bf16 %v4145_v51  ;;  %v1803_v1 = vsel %vm1802_vm5, %v1770_v37, %v2749_v62 }
  0xfe   : > { %v2414_v39 = vpack.c.bf16 %v1952_v4, %v1951_v14  ;;  %v1804_v31 = vsel %vm1802_vm5, %v1771_v21, %v2750_v52  ;;  %v3126_v42 = vpack.i.bf16 %v4882_v10, %v4670_v18  ;;  %v2539_v23 = vunpack.i.l.bf16 %v4145_v51 }
  0xff   : > { %v1836_v38 = vsel %vm1835_vm6, %v1803_v1, %v2759_v24  ;;  %v1837_v28 = vsel %vm1835_vm6, %v1804_v31, %v2760_v45  ;;  %v2788_v40 = vpop.permute.xlu0 %2787  ;;  %v5675_v63 = vpack.i.bf16 %v4717_v35, %v4714_v8  ;;  %v3141_v37 = vpack.i.bf16 %v4949_v32, %v4946_v41  ;;  %v4990_v24 = vld [vmem:[%s3362_s27 + $0x1c8] sm:$0xff] }
 0x100   : > { %3067 = vrot.lane.b32.xlu0 %v5674_v7, %s3281_s3  ;;  %2416 = vmatprep.subr.msk.bf16.mxu0 %vm4941_vm11, %v2414_v39  ;;  %v1869_v52 = vsel %vm1868_vm7, %v1836_v38, %v2769_v9  ;;  %v1870_v62 = vsel %vm1868_vm7, %v1837_v28, %v2770_v2  ;;  %v2790_v54 = vunpack.i.h.bf16 %v2788_v40  ;;  %v2789_v3 = vunpack.i.l.bf16 %v2788_v40  ;;  %v5680_v38 = vld [vmem:[#allocation33_spill] sm:$0xff] }
 0x101   : > { %3082 = vrot.lane.b32.xlu1 %v5675_v63, %s3283_s5  ;;  %v1902_v44 = vsel %vm1901_vm8, %v1869_v52, %v2779_v25  ;;  %v1903_v5 = vsel %vm1901_vm8, %v1870_v62, %v2780_v61  ;;  %v5676_v8 = vpack.i.bf16 %v4778_v6, %v5661_v26  ;;  %v4985_v35 = vpop.permute.xlu1 %2802  ;;  %v1387_v13 = vrot.slane %v4949_v32, 2  ;;  %v5678_v26 = vld [vmem:[#allocation8_spill] sm:$0xff]  ;;  %v3190_v62 = vld [vmem:[%s3362_s27 + $0x20] sm:$0xff] }
 0x102   : > { %v1386_v45 = vrot.slane %v4946_v41, 2  ;;  %v2535_v58 = vunpack.i.h.bf16 %v5677_v53  ;;  %v1935_v15 = vsel %vm1934_vm9, %v1902_v44, %v2789_v3  ;;  %v1936_v12 = vsel %vm1934_vm9, %v1903_v5, %v2790_v54  ;;  %v5006_v25 = vld [vmem:[%s3362_s27 + $0x118] sm:$0xf]  ;;  %v5682_v3 = vld [vmem:[#allocation11_spill] sm:$0xff] }
 0x103   : > { %v1427_v2 = vrot.slane %v4975_v0, 2  ;;  %v2534_v6 = vunpack.i.l.bf16 %v5677_v53  ;;  %v2575_v9 = vunpack.i.h.bf16 %v5678_v26  ;;  %v4998_v14 = vpop.permute.xlu0 %2797  ;;  %v5679_v4 = vpack.i.bf16 %v4807_v22, %v4796_v50  ;;  %v3191_v5 = vld [vmem:[%s3362_s27 + $0x18] sm:$0xff]  ;;  %v3192_v53 = vld [vmem:[%s3362_s27 + $0xe0] sm:$0xff] }
 0x104   : > { %3077 = vrot.lane.b32.xlu0 %v5676_v8, %s3282_s4  ;;  %v2417_v21 = vpack.c.bf16 %v1936_v12, %v1935_v15  ;;  %v1563_v61 = vrot.slane %v4949_v32, 4  ;;  %v2574_v7 = vunpack.i.l.bf16 %v5678_v26  ;;  %v1562_v39 = vrot.slane %v4946_v41, 4 }
 0x105   : > { %3092 = vrot.lane.b32.xlu1 %v5679_v4, %s3284_s6  ;;  %v1603_v1 = vrot.slane %v4975_v0, 4  ;;  %v1426_v31 = vrot.slane %v4990_v24, 2  ;;  %v2615_v28 = vunpack.i.h.bf16 %v5680_v38  ;;  %v2614_v50 = vunpack.i.l.bf16 %v5680_v38  ;;  %v2813_v40 = vpop.permute.xlu1 %2812  ;;  %v3193_v4 = vld [vmem:[%s3362_s27 + $0xd8] sm:$0xff] }
 0x106   : > { %v5681_v22 = vpack.i.bf16 %v4739_v33, %v4753_v27  ;;  %2419 = vmatpush3.bf16.xpose.msk.msra.mxu0 %vm4941_vm11, %v2417_v21  ;;  %v1602_v63 = vrot.slane %v4990_v24, 4  ;;  %v5024_v52 = vsel %vm357_vm0, %v1386_v45, %v1387_v13  ;;  %v1707_v54 = vsel %vm1703_vm2, %v3190_v62, %v2535_v58 }
 0x107   : > { %v2655_v44 = vunpack.i.h.bf16 %v5682_v3  ;;  %v2654_v33 = vunpack.i.l.bf16 %v5682_v3  ;;  %v1389_v27 = vrot.slane %v5006_v25, 2  ;;  %v1706_v8 = vsel %vm1703_vm2, %v3191_v5, %v2534_v6  ;;  %v2808_v26 = vpop.permute.xlu0 %2807 }
 0x108   : > { %3087 = vrot.lane.b32.xlu0 %v5681_v22, %s3283_s5  ;;  %v1723_v15 = vsel %vm1703_vm2, %v3192_v53, %v2575_v9  ;;  %v2735_v12 = vunpack.i.h.bf16 %v4742_v59  ;;  %v2734_v45 = vunpack.i.l.bf16 %v4742_v59  ;;  %v5683_v58 = vpack.i.bf16 %v4815_v48, %v4812_v47 }
 0x109   : > { %v1722_v21 = vsel %vm1703_vm2, %v3193_v4, %v2574_v7  ;;  %v2694_v38 = vunpack.i.l.bf16 %v4583_v30  ;;  %v2795_v6 = vunpack.i.h.bf16 %v4956_v36  ;;  %v2794_v22 = vunpack.i.l.bf16 %v4956_v36  ;;  %v2823_v48 = vpop.permute.xlu1 %2822 }
 0x10a   : > { %3102 = vrot.lane.b32.xlu1 %v5683_v58, %s3285_s7  ;;  %v1739_v9 = vsel %vm1736_vm3, %v1706_v8, %v2614_v50  ;;  %v1740_v62 = vsel %vm1736_vm3, %v1707_v54, %v2615_v28  ;;  %v2805_v59 = vunpack.i.h.bf16 %v4985_v35  ;;  %v2804_v3 = vunpack.i.l.bf16 %v4985_v35 }
 0x10b   : > { %v5684_v47 = vpack.i.bf16 %v4828_v11, %v4818_v43  ;;  %v1756_v7 = vsel %vm1736_vm3, %v1723_v15, %v2655_v44  ;;  %v1755_v5 = vsel %vm1736_vm3, %v1722_v21, %v2654_v33  ;;  %v2815_v53 = vunpack.i.h.bf16 %v2813_v40  ;;  %v2818_v58 = vpop.permute.xlu0 %2817 }
 0x10c   : > { %v2814_v36 = vunpack.i.l.bf16 %v2813_v40  ;;  %v1788_v50 = vsel %vm1769_vm4, %v1755_v5, %v2734_v45  ;;  %v1789_v28 = vsel %vm1769_vm4, %v1756_v7, %v2735_v12  ;;  %v2825_v54 = vunpack.i.h.bf16 %v2823_v48 }
 0x10d   : > { %3097 = vrot.lane.b32.xlu0 %v5684_v47, %s3284_s6  ;;  %v2824_v8 = vunpack.i.l.bf16 %v2823_v48  ;;  %v2695_v43 = vunpack.i.h.bf16 %v4583_v30  ;;  %v1772_v11 = vsel %vm1769_vm4, %v1739_v9, %v2694_v38  ;;  %v1821_v35 = vsel %vm1802_vm5, %v1788_v50, %v2794_v22  ;;  %v2833_v30 = vpop.permute.xlu1 %2832 }
 0x10e   : > { %3112 = vrot.lane.b32.xlu1 %v4682_v49, %s3280_s30  ;;  %v1822_v44 = vsel %vm1802_vm5, %v1789_v28, %v2795_v6  ;;  %v1854_v40 = vsel %vm1835_vm6, %v1821_v35, %v2804_v3  ;;  %v2800_v15 = vunpack.i.h.bf16 %v4998_v14  ;;  %v2799_v12 = vunpack.i.l.bf16 %v4998_v14  ;;  %s3202_s30 = sshll.u32 %s3286_s12, 4  ;;  %s3203_s30 = int_to_ptr.vmem [resolvable:$false] %s3202_s30 }
 0x10f   : > { %v1855_v33 = vsel %vm1835_vm6, %v1822_v44, %v2805_v59  ;;  %v5685_v49 = vpack.i.bf16 %v4831_v57, %v4821_v29  ;;  %v1887_v45 = vsel %vm1868_vm7, %v1854_v40, %v2814_v36  ;;  %v2835_v21 = vunpack.i.h.bf16 %v2833_v30  ;;  %v2828_v3 = vpop.permute.xlu0 %2827  ;;  %v2340_v29 = vld [vmem:[%s3362_s27 + $0x1d8] sm:$0xf]  ;;  %p3205_p1 = scmp.lt.s32.totalorder %s5379_s23, %s3203_s30 }
 0x110   : > { %v1888_v4 = vsel %vm1868_vm7, %v1855_v33, %v2815_v53  ;;  %v2834_v38 = vunpack.i.l.bf16 %v2833_v30  ;;  %v2810_v6 = vunpack.i.h.bf16 %v2808_v26  ;;  %v2809_v22 = vunpack.i.l.bf16 %v2808_v26 }
 0x111   : > { %3107 = vrot.lane.b32.xlu0 %v5685_v49, %s3285_s7  ;;  %v1920_v9 = vsel %vm1901_vm8, %v1887_v45, %v2824_v8  ;;  %v1921_v59 = vsel %vm1901_vm8, %v1888_v4, %v2825_v54  ;;  %v5686_v14 = vpack.i.bf16 %v4835_v16, %v5665_v46  ;;  %v2820_v57 = vunpack.i.h.bf16 %v2818_v58  ;;  %v5088_v28 = vpop.permute.xlu1 %2842 }
 0x112   : > { %v2819_v47 = vunpack.i.l.bf16 %v2818_v58  ;;  %v1953_v48 = vsel %vm1934_vm9, %v1920_v9, %v2834_v38  ;;  %v1954_v7 = vsel %vm1934_vm9, %v1921_v59, %v2835_v21  ;;  %v1773_v5 = vsel %vm1769_vm4, %v1740_v62, %v2695_v43  ;;  %v3196_v9 = vld [vmem:[%s3362_s27 + $0xf8] sm:$0xff] }
 0x113   : > { %3122 = vrot.lane.b32.xlu1 %v5686_v14, %s3281_s3  ;;  %v2420_v26 = vpack.c.bf16 %v1954_v7, %v1953_v48  ;;  %v2830_v53 = vunpack.i.h.bf16 %v2828_v3  ;;  %v2829_v36 = vunpack.i.l.bf16 %v2828_v3  ;;  %v5687_v50 = vpack.i.bf16 %v4839_v19, %v4659_v17  ;;  %v2838_v43 = vpop.permute.xlu0 %2837  ;;  %v5691_v3 = vld [vmem:[#allocation22_spill] sm:$0xff] }
 0x114   : > { %v1805_v16 = vsel %vm1802_vm5, %v1772_v11, %v2799_v12  ;;  %v1806_v46 = vsel %vm1802_vm5, %v1773_v5, %v2800_v15  ;;  %v1390_v62 = vsel %vm357_vm0, %v1387_v13, %v1389_v27  ;;  %v1429_v54 = vrot.slane %v2340_v29, 2 }
 0x115   : > { %3117 = vrot.lane.b32.xlu0 %v5687_v50, %s3281_s3  ;;  %v1838_v8 = vsel %vm1835_vm6, %v1805_v16, %v2809_v22  ;;  %v1839_v58 = vsel %vm1835_vm6, %v1806_v46, %v2810_v6  ;;  %v5688_v17 = vpack.i.bf16 %v4844_v56, %v5667_v20  ;;  %2422 = vmatprep.subr.msk.bf16.mxu0 %vm4941_vm11, %v2420_v26  ;;  %v1565_v19 = vrot.slane %v5006_v25, 4  ;;  %v5114_v56 = vpop.permute.xlu1 %2852  ;;  %v5171_v22 = vld [vmem:[%s5430_s1] sm:$0xff]  ;;  %s3204_s3 = scalar_lea.vmem %s3203_s30, 512 }
 0x116   : > { %v1605_v11 = vrot.slane %v2340_v29, 4  ;;  %v1871_v35 = vsel %vm1868_vm7, %v1838_v8, %v2819_v47  ;;  %v1872_v13 = vsel %vm1868_vm7, %v1839_v58, %v2820_v57  ;;  %v2840_v27 = vunpack.i.h.bf16 %v2838_v43  ;;  %2412 = vmatprep.mubr.msk.f32.mxu0 %vm1968_vm10, %v5171_v22  ;;  %v5692_v47 = vld [vmem:[#allocation37_spill] sm:$0xff]  ;;  %p3206_p2 = scmp.lt.s32.totalorder %s3204_s3, %s3198_s29 }
 0x117   : > { %3132 = vrot.lane.b32.xlu1 %v5688_v17, %s3282_s4  ;;  %v2839_v44 = vunpack.i.l.bf16 %v2838_v43  ;;  %v1904_v40 = vsel %vm1901_vm8, %v1871_v35, %v2829_v36  ;;  %v1905_v33 = vsel %vm1901_vm8, %v1872_v13, %v2830_v53  ;;  %v3136_v20 = vpack.i.bf16 %v4975_v0, %v4990_v24  ;;  %v5134_v45 = vpop.permute.xlu0 %2847 }
 0x118   : > { %v1428_v25 = vsel %vm357_vm0, %v1426_v31, %v1427_v2  ;;  %v1938_v12 = vsel %vm1934_vm9, %v1905_v33, %v2840_v27  ;;  %v1430_v18 = vsel %vm357_vm0, %v1427_v2, %v1429_v54  ;;  %v1564_v10 = vsel %vm534_vm1, %v1562_v39, %v1563_v61  ;;  %p3207_p3 = por %p3206_p2, %p3205_p1 }
 0x119   : > { %3127 = vrot.lane.b32.xlu0 %v3126_v42, %s3282_s4  ;;  %v1937_v15 = vsel %vm1934_vm9, %v1904_v40, %v2839_v44  ;;  %v5689_v42 = vld [vmem:[#allocation28_spill] sm:$0xff]  ;;  %v3151_v31 = vpack.i.bf16 %v1390_v62, %v5024_v52  ;;  %v1566_v2 = vsel %vm534_vm1, %v1563_v61, %v1565_v19  ;;  %v1604_v39 = vsel %vm534_vm1, %v1602_v63, %v1603_v1  ;;  %v5690_v52 = vld [vmem:[#allocation9_spill] sm:$0xff]  ;;  %v2863_v24 = vpop.permute.xlu1 %2862  ;;  %v3195_v63 = vld [vmem:[%s3362_s27 + $0x30] sm:$0xff] }
 0x11a   : > { %v2580_v49 = vunpack.i.h.bf16 %v5689_v42  ;;  %v2423_v30 = vpack.c.bf16 %v1938_v12, %v1937_v15  ;;  %v2579_v4 = vunpack.i.l.bf16 %v5689_v42  ;;  %v1606_v41 = vsel %vm534_vm1, %v1603_v1, %v1605_v11  ;;  %p3208_p5 = pnand %p3207_p3, %p3201_p0 }
 0x11b   : > { %3142 = vrot.lane.b32.xlu1 %v3141_v37, %s3283_s5  ;;  %v3194_v37 = vld [vmem:[%s3362_s27 + $0x38] sm:$0xff]  ;;  %v2620_v61 = vunpack.i.h.bf16 %v5690_v52  ;;  %v2619_v21 = vunpack.i.l.bf16 %v5690_v52  ;;  %v3146_v0 = vpack.i.bf16 %v1430_v18, %v1428_v25  ;;  %v1708_v1 = vsel %vm1703_vm2, %v3195_v63, %v2539_v23  ;;  %v2858_v51 = vpop.permute.xlu0 %2857 }
 0x11c   : > { %v1709_v32 = vsel %vm1703_vm2, %v3194_v37, %v2540_v55  ;;  %2425 = vmatpush3.bf16.xpose.msk.msra.mxu0 %vm4941_vm11, %v2423_v30  ;;  %v2660_v38 = vunpack.i.h.bf16 %v4499_v60  ;;  %v2659_v55 = vunpack.i.l.bf16 %v4499_v60  ;;  %v3161_v6 = vpack.i.bf16 %v1566_v2, %v1564_v10  ;;  %v3197_v60 = vld [vmem:[%s3362_s27 + $0xf0] sm:$0xff]  ;;  %s5384_s27 = scalar_lea.hbm %s5431_s2, %s2379_s24 }
 0x11d   : > { %3137 = vrot.lane.b32.xlu0 %v3136_v20, %s3283_s5  ;;  %v1725_v59 = vsel %vm1703_vm2, %v3196_v9, %v2580_v49  ;;  %v2740_v14 = vunpack.i.h.bf16 %v5691_v3  ;;  %v2739_v29 = vunpack.i.l.bf16 %v5691_v3  ;;  %v3156_v23 = vpack.i.bf16 %v1606_v41, %v1604_v39  ;;  %v2873_v16 = vpop.permute.xlu1 %2872 }
 0x11e   : > { %v1724_v57 = vsel %vm1703_vm2, %v3197_v60, %v2579_v4  ;;  %v2699_v48 = vunpack.i.l.bf16 %v5692_v47  ;;  %v2845_v7 = vunpack.i.h.bf16 %v5088_v28  ;;  %v2844_v5 = vunpack.i.l.bf16 %v5088_v28 }
 0x11f   : > { %3152 = vrot.lane.b32.xlu1 %v3151_v31, %s3284_s6  ;;  %v1742_v26 = vsel %vm1736_vm3, %v1709_v32, %v2620_v61  ;;  %v1741_v53 = vsel %vm1736_vm3, %v1708_v1, %v2619_v21  ;;  %v2855_v36 = vunpack.i.h.bf16 %v5114_v56  ;;  %v2854_v50 = vunpack.i.l.bf16 %v5114_v56  ;;  %v2868_v19 = vpop.permute.xlu0 %2867 }
 0x120   : > { %v1757_v46 = vsel %vm1736_vm3, %v1724_v57, %v2659_v55  ;;  %v1758_v62 = vsel %vm1736_vm3, %v1725_v59, %v2660_v38  ;;  %v2865_v54 = vunpack.i.h.bf16 %v2863_v24  ;;  %v2864_v8 = vunpack.i.l.bf16 %v2863_v24 }
 0x121   : > { %3147 = vrot.lane.b32.xlu0 %v3146_v0, %s3284_s6  ;;  %v1790_v58 = vsel %vm1769_vm4, %v1757_v46, %v2739_v29  ;;  %v1791_v28 = vsel %vm1769_vm4, %v1758_v62, %v2740_v14  ;;  %v2875_v43 = vunpack.i.h.bf16 %v2873_v16  ;;  %v2874_v17 = vunpack.i.l.bf16 %v2873_v16  ;;  %v2883_v20 = vpop.permute.xlu1 %2882 }
 0x122   : > { %v2700_v11 = vunpack.i.h.bf16 %v5692_v47  ;;  %v1774_v35 = vsel %vm1769_vm4, %v1741_v53, %v2699_v48  ;;  %v1823_v13 = vsel %vm1802_vm5, %v1790_v58, %v2844_v5  ;;  %v1824_v27 = vsel %vm1802_vm5, %v1791_v28, %v2845_v7  ;;  %v5694_v58 = vld [vmem:[#allocation24_spill] sm:$0xff] }
 0x123   : > { %3162 = vrot.lane.b32.xlu1 %v3161_v6, %s3285_s7  ;;  %v1856_v44 = vsel %vm1835_vm6, %v1823_v13, %v2854_v50  ;;  %v1857_v40 = vsel %vm1835_vm6, %v1824_v27, %v2855_v36  ;;  %v2850_v33 = vunpack.i.h.bf16 %v5134_v45  ;;  %v2849_v56 = vunpack.i.l.bf16 %v5134_v45  ;;  %v2878_v31 = vpop.permute.xlu0 %2877  ;;  %v5696_v13 = vld [vmem:[#allocation5_spill] sm:$0xff] }
 0x124   : > { %v1889_v25 = vsel %vm1868_vm7, %v1856_v44, %v2864_v8  ;;  %v1890_v15 = vsel %vm1868_vm7, %v1857_v40, %v2865_v54  ;;  %v2885_v12 = vunpack.i.h.bf16 %v2883_v20  ;;  %v2884_v18 = vunpack.i.l.bf16 %v2883_v20  ;;  %v5693_v54 = vld [vmem:[#allocation29_spill] sm:$0xff] }
 0x125   : > { %3157 = vrot.lane.b32.xlu0 %v3156_v23, %s3285_s7  ;;  %v2860_v10 = vunpack.i.h.bf16 %v2858_v51  ;;  %v2859_v42 = vunpack.i.l.bf16 %v2858_v51  ;;  %v1922_v49 = vsel %vm1901_vm8, %v1889_v25, %v2874_v17  ;;  %v1923_v30 = vsel %vm1901_vm8, %v1890_v15, %v2875_v43  ;;  %v2893_v61 = vpop.permute.xlu1 %2892 }
 0x126   : > { %v2870_v2 = vunpack.i.h.bf16 %v2868_v19  ;;  %v2869_v4 = vunpack.i.l.bf16 %v2868_v19  ;;  %v1955_v45 = vsel %vm1934_vm9, %v1922_v49, %v2884_v18  ;;  %v1956_v39 = vsel %vm1934_vm9, %v1923_v30, %v2885_v12 }
 0x127   : > { %v1775_v41 = vsel %vm1769_vm4, %v1742_v26, %v2700_v11  ;;  %v2426_v37 = vpack.c.bf16 %v1956_v39, %v1955_v45  ;;  %v2880_v32 = vunpack.i.h.bf16 %v2878_v31  ;;  %v2879_v52 = vunpack.i.l.bf16 %v2878_v31  ;;  %v2888_v1 = vpop.permute.xlu0 %2887  ;;  %v5695_v11 = vld [vmem:[#allocation40_spill] sm:$0xff] }
 0x128   : > { %v1807_v21 = vsel %vm1802_vm5, %v1774_v35, %v2849_v56  ;;  %v1808_v24 = vsel %vm1802_vm5, %v1775_v41, %v2850_v33  ;;  %v2890_v6 = vunpack.i.h.bf16 %v2888_v1  ;;  %v2889_v9 = vunpack.i.l.bf16 %v2888_v1 }
 0x129   : > { %v1840_v0 = vsel %vm1835_vm6, %v1807_v21, %v2859_v42  ;;  %v1841_v63 = vsel %vm1835_vm6, %v1808_v24, %v2860_v10  ;;  %2428 = vmatprep.subr.msk.bf16.mxu0 %vm4941_vm11, %v2426_v37  ;;  %v2903_v14 = vpop.permute.xlu1 %2902  ;;  %v2895_v48 = vunpack.i.h.bf16 %v2893_v61  ;;  %v2894_v7 = vunpack.i.l.bf16 %v2893_v61 }
 0x12a   : > { %v1873_v38 = vsel %vm1868_vm7, %v1840_v0, %v2869_v4  ;;  %v1874_v55 = vsel %vm1868_vm7, %v1841_v63, %v2870_v2  ;;  %v2905_v26 = vunpack.i.h.bf16 %v2903_v14  ;;  %v2904_v53 = vunpack.i.l.bf16 %v2903_v14 }
 0x12b   : > { %v1906_v59 = vsel %vm1901_vm8, %v1873_v38, %v2879_v52  ;;  %v1907_v3 = vsel %vm1901_vm8, %v1874_v55, %v2880_v32  ;;  %v2898_v60 = vpop.permute.xlu0 %2897  ;;  %v1792_v8 = vsel %vm1769_vm4, %v5693_v54, %v2894_v7  ;;  %v1793_v28 = vsel %vm1769_vm4, %v5694_v58, %v2895_v48 }
 0x12c   : > { %v1939_v29 = vsel %vm1934_vm9, %v1906_v59, %v2889_v9  ;;  %v1940_v51 = vsel %vm1934_vm9, %v1907_v3, %v2890_v6  ;;  %v2900_v50 = vunpack.i.h.bf16 %v2898_v60  ;;  %v2899_v16 = vunpack.i.l.bf16 %v2898_v60 }
 0x12d   : > { %v2429_v23 = vpack.c.bf16 %v1940_v51, %v1939_v29  ;;  %v2913_v57 = vpop.permute.xlu1 %2912  ;;  %v1809_v35 = vsel %vm1802_vm5, %v5695_v11, %v2904_v53  ;;  %v1810_v27 = vsel %vm1802_vm5, %v5696_v13, %v2905_v26  ;;  %v5697_v53 = vld [vmem:[#allocation41_spill] sm:$0xff] }
 0x12e   : > { %v2915_v46 = vunpack.i.h.bf16 %v2913_v57  ;;  %v2914_v62 = vunpack.i.l.bf16 %v2913_v57  ;;  %v1826_v12 = vsel %vm1802_vm5, %v1793_v28, %v2900_v50  ;;  %v1825_v18 = vsel %vm1802_vm5, %v1792_v8, %v2899_v16  ;;  %v5698_v50 = vld [vmem:[#allocation34_spill] sm:$0xff] }
 0x12f   : > { %2431 = vmatpush3.bf16.xpose.msk.msra.mxu0 %vm4941_vm11, %v2429_v23  ;;  %v2908_v47 = vpop.permute.xlu0 %2907 }
 0x130   : > { %v2910_v43 = vunpack.i.h.bf16 %v2908_v47  ;;  %v2909_v17 = vunpack.i.l.bf16 %v2908_v47  ;;  %v1842_v10 = vsel %vm1835_vm6, %v1809_v35, %v2914_v62  ;;  %v1843_v42 = vsel %vm1835_vm6, %v1810_v27, %v2915_v46 }
 0x131   : > { %v2923_v5 = vpop.permute.xlu1 %2922 }
 0x132   : > { %v2925_v44 = vunpack.i.h.bf16 %v2923_v5  ;;  %v2924_v40 = vunpack.i.l.bf16 %v2923_v5  ;;  %v1858_v49 = vsel %vm1835_vm6, %v1825_v18, %v2909_v17  ;;  %v1859_v30 = vsel %vm1835_vm6, %v1826_v12, %v2910_v43 }
 0x133   : > { %v2918_v36 = vpop.permute.xlu0 %2917 }
 0x134   : > { %v2920_v33 = vunpack.i.h.bf16 %v2918_v36  ;;  %v2919_v56 = vunpack.i.l.bf16 %v2918_v36  ;;  %v1875_v45 = vsel %vm1868_vm7, %v1842_v10, %v2924_v40  ;;  %v1876_v39 = vsel %vm1868_vm7, %v1843_v42, %v2925_v44 }
 0x136   : > { %v1891_v32 = vsel %vm1868_vm7, %v1858_v49, %v2919_v56  ;;  %v1892_v52 = vsel %vm1868_vm7, %v1859_v30, %v2920_v33 }
 0x137   : > { %v2933_v19 = vpop.permute.xlu1 %2932 }
 0x138   : > { %v2935_v20 = vunpack.i.h.bf16 %v2933_v19  ;;  %v2934_v25 = vunpack.i.l.bf16 %v2933_v19 }
 0x139   : > { %v2928_v15 = vpop.permute.xlu0 %2927 }
 0x13a   : > { %v2930_v31 = vunpack.i.h.bf16 %v2928_v15  ;;  %v2929_v2 = vunpack.i.l.bf16 %v2928_v15  ;;  %v1908_v61 = vsel %vm1901_vm8, %v1875_v45, %v2934_v25  ;;  %v1909_v21 = vsel %vm1901_vm8, %v1876_v39, %v2935_v20 }
 0x13b   : > { %v2943_v4 = vpop.permute.xlu1 %2942 }
 0x13c   : > { %v2945_v41 = vunpack.i.h.bf16 %v2943_v4  ;;  %v2944_v37 = vunpack.i.l.bf16 %v2943_v4  ;;  %v1924_v55 = vsel %vm1901_vm8, %v1891_v32, %v2929_v2  ;;  %v1925_v6 = vsel %vm1901_vm8, %v1892_v52, %v2930_v31  ;;  %v5700_v52 = vld [vmem:[#allocation25_spill] sm:$0xff] }
 0x13d   : > { %v2938_v24 = vpop.permute.xlu0 %2937 }
 0x13e   : > { %v1941_v0 = vsel %vm1934_vm9, %v1908_v61, %v2944_v37  ;;  %v1942_v63 = vsel %vm1934_vm9, %v1909_v21, %v2945_v41  ;;  %v2940_v1 = vunpack.i.h.bf16 %v2938_v24  ;;  %v2939_v38 = vunpack.i.l.bf16 %v2938_v24  ;;  %v5699_v37 = vld [vmem:[#allocation10_spill] sm:$0xff] }
 0x13f   : > { %v2435_v9 = vpack.c.bf16 %v1942_v63, %v1941_v0  ;;  %v2953_v59 = vpop.permute.xlu1 %2952 }
 0x140   : > { %v1957_v3 = vsel %vm1934_vm9, %v1924_v55, %v2939_v38  ;;  %v1958_v14 = vsel %vm1934_vm9, %v1925_v6, %v2940_v1  ;;  %v2955_v5 = vunpack.i.h.bf16 %v2953_v59  ;;  %v2954_v26 = vunpack.i.l.bf16 %v2953_v59 }
 0x141   : > { %v2432_v29 = vpack.c.bf16 %v1958_v14, %v1957_v3  ;;  %v2948_v51 = vpop.permute.xlu0 %2947 }
 0x142   : > { %v2950_v57 = vunpack.i.h.bf16 %v2948_v51  ;;  %v2949_v47 = vunpack.i.l.bf16 %v2948_v51 }
 0x143   : > { %2434 = vmatprep.subr.msk.bf16.mxu0 %vm4941_vm11, %v2432_v29  ;;  %v2963_v23 = vpop.permute.xlu1 %2962 }
 0x144   : > { %2437 = vmatpush3.bf16.xpose.msk.msra.mxu0 %vm4941_vm11, %v2435_v9  ;;  %v1794_v36 = vsel %vm1769_vm4, %v5697_v53, %v2949_v47  ;;  %v1795_v16 = vsel %vm1769_vm4, %v5698_v50, %v2950_v57  ;;  %v2965_v46 = vunpack.i.h.bf16 %v2963_v23  ;;  %v2964_v62 = vunpack.i.l.bf16 %v2963_v23 }
 0x145   : > { %v2958_v60 = vpop.permute.xlu0 %2957  ;;  %v1827_v19 = vsel %vm1802_vm5, %v1794_v36, %v2954_v26  ;;  %v1828_v11 = vsel %vm1802_vm5, %v1795_v16, %v2955_v5 }
 0x146   : > { %v1860_v35 = vsel %vm1835_vm6, %v1827_v19, %v2964_v62  ;;  %v1861_v13 = vsel %vm1835_vm6, %v1828_v11, %v2965_v46  ;;  %v2960_v27 = vunpack.i.h.bf16 %v2958_v60  ;;  %v2959_v44 = vunpack.i.l.bf16 %v2958_v60  ;;  %v5701_v46 = vld [vmem:[#allocation38_spill] sm:$0xff]  ;;  %v5704_v11 = vld [vmem:[#allocation44_spill] sm:$0xff] }
 0x147   : > { %v2973_v48 = vpop.permute.xlu1 %2972 }
 0x148   : > { %v2975_v8 = vunpack.i.h.bf16 %v2973_v48  ;;  %v2974_v58 = vunpack.i.l.bf16 %v2973_v48  ;;  %v1811_v32 = vsel %vm1802_vm5, %v5699_v37, %v2959_v44  ;;  %v1812_v61 = vsel %vm1802_vm5, %v5700_v52, %v2960_v27 }
 0x14a   : > { %v2968_v7 = vpop.permute.xlu0 %2967  ;;  %v1893_v33 = vsel %vm1868_vm7, %v1860_v35, %v2974_v58  ;;  %v1894_v56 = vsel %vm1868_vm7, %v1861_v13, %v2975_v8 }
 0x14b   : > { %v2983_v54 = vpop.permute.xlu1 %2982  ;;  %v2970_v15 = vunpack.i.h.bf16 %v2968_v7  ;;  %v2969_v12 = vunpack.i.l.bf16 %v2968_v7 }
 0x14c   : > { %v2985_v28 = vunpack.i.h.bf16 %v2983_v54  ;;  %v2984_v43 = vunpack.i.l.bf16 %v2983_v54  ;;  %v5702_v54 = vld [vmem:[#allocation47_spill] sm:$0xff] }
 0x14d   : > { %v1844_v21 = vsel %vm1835_vm6, %v1811_v32, %v2969_v12  ;;  %v1845_v24 = vsel %vm1835_vm6, %v1812_v61, %v2970_v15 }
 0x14e   : > { %v2978_v17 = vpop.permute.xlu0 %2977  ;;  %v1926_v18 = vsel %vm1901_vm8, %v1893_v33, %v2984_v43  ;;  %v1927_v10 = vsel %vm1901_vm8, %v1894_v56, %v2985_v28 }
 0x14f   : > { %v2993_v40 = vpop.permute.xlu1 %2992  ;;  %v2980_v49 = vunpack.i.h.bf16 %v2978_v17  ;;  %v2979_v30 = vunpack.i.l.bf16 %v2978_v17  ;;  %v5703_v17 = vld [vmem:[#allocation27_spill] sm:$0xff] }
 0x150   : > { %v2995_v20 = vunpack.i.h.bf16 %v2993_v40  ;;  %v2994_v25 = vunpack.i.l.bf16 %v2993_v40 }
 0x151   : > { %v1877_v63 = vsel %vm1868_vm7, %v1844_v21, %v2979_v30  ;;  %v1878_v1 = vsel %vm1868_vm7, %v1845_v24, %v2980_v49 }
 0x152   : > { %v2988_v42 = vpop.permute.xlu0 %2987  ;;  %v1959_v31 = vsel %vm1934_vm9, %v1926_v18, %v2994_v25  ;;  %v1960_v2 = vsel %vm1934_vm9, %v1927_v10, %v2995_v20 }
 0x153   : > { %v2438_v4 = vpack.c.bf16 %v1960_v2, %v1959_v31  ;;  %v2990_v45 = vunpack.i.h.bf16 %v2988_v42  ;;  %v2989_v39 = vunpack.i.l.bf16 %v2988_v42  ;;  %v3003_v41 = vpop.permute.xlu1 %3002 }
 0x154   : > { %v3005_v57 = vunpack.i.h.bf16 %v3003_v41  ;;  %v3004_v47 = vunpack.i.l.bf16 %v3003_v41 }
 0x155   : > { %2440 = vmatprep.subr.msk.bf16.mxu0 %vm4941_vm11, %v2438_v4  ;;  %v1910_v6 = vsel %vm1901_vm8, %v1877_v63, %v2989_v39  ;;  %v1911_v9 = vsel %vm1901_vm8, %v1878_v1, %v2990_v45 }
 0x156   : > { %v2998_v0 = vpop.permute.xlu0 %2997  ;;  %v1796_v62 = vsel %vm1769_vm4, %v5701_v46, %v3004_v47  ;;  %v1797_v8 = vsel %vm1769_vm4, %v5702_v54, %v3005_v57 }
 0x157   : > { %v3000_v38 = vunpack.i.h.bf16 %v2998_v0  ;;  %v2999_v55 = vunpack.i.l.bf16 %v2998_v0  ;;  %v3013_v59 = vpop.permute.xlu1 %3012 }
 0x158   : > { %v3015_v7 = vunpack.i.h.bf16 %v3013_v59  ;;  %v3014_v5 = vunpack.i.l.bf16 %v3013_v59 }
 0x159   : > { %v1943_v3 = vsel %vm1934_vm9, %v1910_v6, %v2999_v55  ;;  %v1944_v14 = vsel %vm1934_vm9, %v1911_v9, %v3000_v38 }
 0x15a   : > { %v2441_v29 = vpack.c.bf16 %v1944_v14, %v1943_v3  ;;  %v3008_v51 = vpop.permute.xlu0 %3007  ;;  %v1813_v19 = vsel %vm1802_vm5, %v5703_v17, %v3014_v5  ;;  %v1814_v35 = vsel %vm1802_vm5, %v5704_v11, %v3015_v7  ;;  %v5705_v5 = vld [vmem:[#allocation6_spill] sm:$0xff] }
 0x15b   : > { %v3023_v23 = vpop.permute.xlu1 %3022  ;;  %v3010_v53 = vunpack.i.h.bf16 %v3008_v51  ;;  %v3009_v36 = vunpack.i.l.bf16 %v3008_v51 }
 0x15c   : > { %2443 = vmatpush3.bf16.xpose.msk.msra.mxu0 %vm4941_vm11, %v2441_v29  ;;  %v3025_v50 = vunpack.i.h.bf16 %v3023_v23  ;;  %v3024_v16 = vunpack.i.l.bf16 %v3023_v23 }
 0x15d   : > { %v1830_v25 = vsel %vm1802_vm5, %v1797_v8, %v3010_v53  ;;  %v1829_v15 = vsel %vm1802_vm5, %v1796_v62, %v3009_v36  ;;  %v5706_v53 = vld [vmem:[#allocation36_spill] sm:$0xff] }
 0x15e   : > { %v3018_v60 = vpop.permute.xlu0 %3017  ;;  %v1846_v12 = vsel %vm1835_vm6, %v1813_v19, %v3024_v16  ;;  %v1847_v18 = vsel %vm1835_vm6, %v1814_v35, %v3025_v50 }
 0x15f   : > { %v3033_v48 = vpop.permute.xlu1 %3032  ;;  %v3020_v58 = vunpack.i.h.bf16 %v3018_v60  ;;  %v3019_v28 = vunpack.i.l.bf16 %v3018_v60 }
 0x160   : > { %v3035_v13 = vunpack.i.h.bf16 %v3033_v48  ;;  %v3034_v27 = vunpack.i.l.bf16 %v3033_v48 }
 0x161   : > { %v1862_v10 = vsel %vm1835_vm6, %v1829_v15, %v3019_v28  ;;  %v1863_v42 = vsel %vm1835_vm6, %v1830_v25, %v3020_v58 }
 0x162   : > { %v3028_v26 = vpop.permute.xlu0 %3027  ;;  %v1879_v2 = vsel %vm1868_vm7, %v1846_v12, %v3034_v27  ;;  %v1880_v4 = vsel %vm1868_vm7, %v1847_v18, %v3035_v13 }
 0x163   : > { %v3043_v43 = vpop.permute.xlu1 %3042  ;;  %v3030_v44 = vunpack.i.h.bf16 %v3028_v26  ;;  %v3029_v40 = vunpack.i.l.bf16 %v3028_v26 }
 0x164   : > { %v3045_v33 = vunpack.i.h.bf16 %v3043_v43  ;;  %v3044_v56 = vunpack.i.l.bf16 %v3043_v43 }
 0x165   : > { %v1895_v41 = vsel %vm1868_vm7, %v1862_v10, %v3029_v40  ;;  %v1896_v37 = vsel %vm1868_vm7, %v1863_v42, %v3030_v44 }
 0x166   : > { %v3038_v20 = vpop.permute.xlu0 %3037  ;;  %v1912_v32 = vsel %vm1901_vm8, %v1879_v2, %v3044_v56  ;;  %v1913_v52 = vsel %vm1901_vm8, %v1880_v4, %v3045_v33 }
 0x167   : > { %v3040_v49 = vunpack.i.h.bf16 %v3038_v20  ;;  %v3039_v30 = vunpack.i.l.bf16 %v3038_v20  ;;  %v3053_v31 = vpop.permute.xlu1 %3052 }
 0x168   : > { %v3055_v45 = vunpack.i.h.bf16 %v3053_v31  ;;  %v3054_v39 = vunpack.i.l.bf16 %v3053_v31 }
 0x169   : > { %v1928_v1 = vsel %vm1901_vm8, %v1895_v41, %v3039_v30  ;;  %v1929_v38 = vsel %vm1901_vm8, %v1896_v37, %v3040_v49  ;;  %v5708_v37 = vld [vmem:[#allocation23_spill] sm:$0xff] }
 0x16a   : > { %v3048_v61 = vpop.permute.xlu0 %3047  ;;  %v1945_v21 = vsel %vm1934_vm9, %v1912_v32, %v3054_v39  ;;  %v1946_v24 = vsel %vm1934_vm9, %v1913_v52, %v3055_v45  ;;  %v5707_v39 = vld [vmem:[#allocation20_spill] sm:$0xff] }
 0x16b   : > { %v3050_v0 = vunpack.i.h.bf16 %v3048_v61  ;;  %v3049_v63 = vunpack.i.l.bf16 %v3048_v61  ;;  %v2447_v55 = vpack.c.bf16 %v1946_v24, %v1945_v21  ;;  %v3063_v6 = vpop.permute.xlu1 %3062 }
 0x16c   : > { %v3065_v48 = vunpack.i.h.bf16 %v3063_v6  ;;  %v3064_v7 = vunpack.i.l.bf16 %v3063_v6 }
 0x16d   : > { %v1961_v9 = vsel %vm1934_vm9, %v1928_v1, %v3049_v63  ;;  %v1962_v59 = vsel %vm1934_vm9, %v1929_v38, %v3050_v0 }
 0x16e   : > { %v2444_v3 = vpack.c.bf16 %v1962_v59, %v1961_v9  ;;  %v3058_v14 = vpop.permute.xlu0 %3057 }
 0x16f   : > { %v3073_v29 = vpop.permute.xlu1 %3072  ;;  %v3060_v23 = vunpack.i.h.bf16 %v3058_v14  ;;  %v3059_v60 = vunpack.i.l.bf16 %v3058_v14 }
 0x170   : > { %2446 = vmatprep.subr.msk.bf16.mxu0 %vm4941_vm11, %v2444_v3  ;;  %v3075_v50 = vunpack.i.h.bf16 %v3073_v29  ;;  %v3074_v16 = vunpack.i.l.bf16 %v3073_v29 }
 0x171   : > { %2449 = vmatpush3.bf16.xpose.msk.msra.mxu0 %vm4941_vm11, %v2447_v55  ;;  %v1798_v26 = vsel %vm1769_vm4, %v5705_v5, %v3059_v60  ;;  %v1799_v36 = vsel %vm1769_vm4, %v5706_v53, %v3060_v23 }
 0x172   : > { %v3068_v51 = vpop.permute.xlu0 %3067  ;;  %v1831_v43 = vsel %vm1802_vm5, %v1798_v26, %v3064_v7  ;;  %v1832_v17 = vsel %vm1802_vm5, %v1799_v36, %v3065_v48 }
 0x173   : > { %v3083_v57 = vpop.permute.xlu1 %3082  ;;  %v1864_v19 = vsel %vm1835_vm6, %v1831_v43, %v3074_v16  ;;  %v1865_v11 = vsel %vm1835_vm6, %v1832_v17, %v3075_v50  ;;  %v3070_v35 = vunpack.i.h.bf16 %v3068_v51  ;;  %v3069_v13 = vunpack.i.l.bf16 %v3068_v51  ;;  %v5709_v50 = vld [vmem:[#allocation30_spill] sm:$0xff]  ;;  %v5712_v17 = vld [vmem:[#allocation12_spill] sm:$0xff] }
 0x174   : > { %v3085_v62 = vunpack.i.h.bf16 %v3083_v57  ;;  %v3084_v54 = vunpack.i.l.bf16 %v3083_v57 }
 0x175   : > { %v1815_v41 = vsel %vm1802_vm5, %v5707_v39, %v3069_v13  ;;  %v1816_v32 = vsel %vm1802_vm5, %v5708_v37, %v3070_v35 }
 0x176   : > { %v3078_v47 = vpop.permute.xlu0 %3077  ;;  %v1897_v44 = vsel %vm1868_vm7, %v1864_v19, %v3084_v54  ;;  %v1898_v40 = vsel %vm1868_vm7, %v1865_v11, %v3085_v62 }
 0x177   : > { %v3093_v46 = vpop.permute.xlu1 %3092  ;;  %v3080_v20 = vunpack.i.h.bf16 %v3078_v47  ;;  %v3079_v25 = vunpack.i.l.bf16 %v3078_v47 }
 0x178   : > { %v3095_v8 = vunpack.i.h.bf16 %v3093_v46  ;;  %v3094_v58 = vunpack.i.l.bf16 %v3093_v46  ;;  %v5710_v46 = vld [vmem:[#allocation26_spill] sm:$0xff] }
 0x179   : > { %v1848_v52 = vsel %vm1835_vm6, %v1815_v41, %v3079_v25  ;;  %v1849_v61 = vsel %vm1835_vm6, %v1816_v32, %v3080_v20 }
 0x17a   : > { %v3088_v28 = vpop.permute.xlu0 %3087  ;;  %v1930_v15 = vsel %vm1901_vm8, %v1897_v44, %v3094_v58  ;;  %v1931_v12 = vsel %vm1901_vm8, %v1898_v40, %v3095_v8 }
 0x17b   : > { %v3090_v10 = vunpack.i.h.bf16 %v3088_v28  ;;  %v3089_v42 = vunpack.i.l.bf16 %v3088_v28  ;;  %v5711_v28 = vld [vmem:[#allocation46_spill] sm:$0xff] }
 0x17c   : > { %v3103_v27 = vpop.permute.xlu1 %3102 }
 0x17d   : > { %v3105_v33 = vunpack.i.h.bf16 %v3103_v27  ;;  %v3104_v56 = vunpack.i.l.bf16 %v3103_v27  ;;  %v1881_v24 = vsel %vm1868_vm7, %v1848_v52, %v3089_v42  ;;  %v1882_v0 = vsel %vm1868_vm7, %v1849_v61, %v3090_v10 }
 0x17f   : > { %v3098_v18 = vpop.permute.xlu0 %3097  ;;  %v1963_v49 = vsel %vm1934_vm9, %v1930_v15, %v3104_v56  ;;  %v1964_v30 = vsel %vm1934_vm9, %v1931_v12, %v3105_v33 }
 0x180   : > { %v2450_v31 = vpack.c.bf16 %v1964_v30, %v1963_v49  ;;  %v3100_v2 = vunpack.i.h.bf16 %v3098_v18  ;;  %v3099_v4 = vunpack.i.l.bf16 %v3098_v18  ;;  %v3113_v45 = vpop.permute.xlu1 %3112 }
 0x181   : > { %v3115_v23 = vunpack.i.h.bf16 %v3113_v45  ;;  %v3114_v60 = vunpack.i.l.bf16 %v3113_v45 }
 0x182   : > { %2452 = vmatprep.subr.msk.bf16.mxu0 %vm4941_vm11, %v2450_v31  ;;  %v1914_v38 = vsel %vm1901_vm8, %v1881_v24, %v3099_v4  ;;  %v1915_v55 = vsel %vm1901_vm8, %v1882_v0, %v3100_v2 }
 0x183   : > { %v3108_v21 = vpop.permute.xlu0 %3107  ;;  %v1800_v16 = vsel %vm1769_vm4, %v5709_v50, %v3114_v60  ;;  %v1801_v62 = vsel %vm1769_vm4, %v5710_v46, %v3115_v23 }
 0x184   : > { %v3110_v63 = vunpack.i.h.bf16 %v3108_v21  ;;  %v3109_v1 = vunpack.i.l.bf16 %v3108_v21 }
 0x185   : > { %v3123_v6 = vpop.permute.xlu1 %3122 }
 0x186   : > { %v1947_v9 = vsel %vm1934_vm9, %v1914_v38, %v3109_v1  ;;  %v1948_v59 = vsel %vm1934_vm9, %v1915_v55, %v3110_v63  ;;  %v3125_v47 = vunpack.i.h.bf16 %v3123_v6  ;;  %v3124_v48 = vunpack.i.l.bf16 %v3123_v6 }
 0x187   : > { %v2453_v3 = vpack.c.bf16 %v1948_v59, %v1947_v9  ;;  %v3118_v14 = vpop.permute.xlu0 %3117 }
 0x188   : > { %v3120_v5 = vunpack.i.h.bf16 %v3118_v14  ;;  %v3119_v26 = vunpack.i.l.bf16 %v3118_v14  ;;  %v1817_v43 = vsel %vm1802_vm5, %v5711_v28, %v3124_v48  ;;  %v1818_v19 = vsel %vm1802_vm5, %v5712_v17, %v3125_v47 }
 0x189   : > { %2455 = vmatpush3.bf16.xpose.msk.msra.mxu0 %vm4941_vm11, %v2453_v3  ;;  %v3133_v29 = vpop.permute.xlu1 %3132 }
 0x18a   : > { %v3135_v53 = vunpack.i.h.bf16 %v3133_v29  ;;  %v3134_v36 = vunpack.i.l.bf16 %v3133_v29  ;;  %v1834_v56 = vsel %vm1802_vm5, %v1801_v62, %v3120_v5  ;;  %v1833_v20 = vsel %vm1802_vm5, %v1800_v16, %v3119_v26 }
 0x18b   : > { %v3128_v51 = vpop.permute.xlu0 %3127 }
 0x18c   : > { %v3130_v54 = vunpack.i.h.bf16 %v3128_v51  ;;  %v3129_v8 = vunpack.i.l.bf16 %v3128_v51  ;;  %v1850_v25 = vsel %vm1835_vm6, %v1817_v43, %v3134_v36  ;;  %v1851_v15 = vsel %vm1835_vm6, %v1818_v19, %v3135_v53 }
 0x18d   : > { %v3143_v57 = vpop.permute.xlu1 %3142 }
 0x18e   : > { %v3145_v11 = vunpack.i.h.bf16 %v3143_v57  ;;  %v3144_v35 = vunpack.i.l.bf16 %v3143_v57  ;;  %v1866_v12 = vsel %vm1835_vm6, %v1833_v20, %v3129_v8  ;;  %v1867_v18 = vsel %vm1835_vm6, %v1834_v56, %v3130_v54 }
 0x18f   : > { %v3138_v7 = vpop.permute.xlu0 %3137 }
 0x190   : > { %v3140_v13 = vunpack.i.h.bf16 %v3138_v7  ;;  %v3139_v27 = vunpack.i.l.bf16 %v3138_v7  ;;  %v1883_v30 = vsel %vm1868_vm7, %v1850_v25, %v3144_v35  ;;  %v1884_v31 = vsel %vm1868_vm7, %v1851_v15, %v3145_v11 }
 0x191   : > { %v3153_v58 = vpop.permute.xlu1 %3152 }
 0x192   : > { %v3155_v44 = vunpack.i.h.bf16 %v3153_v58  ;;  %v3154_v40 = vunpack.i.l.bf16 %v3153_v58  ;;  %v1899_v45 = vsel %vm1868_vm7, %v1866_v12, %v3139_v27  ;;  %v1900_v39 = vsel %vm1868_vm7, %v1867_v18, %v3140_v13 }
 0x193   : > { %v3148_v33 = vpop.permute.xlu0 %3147 }
 0x194   : > { %v3150_v10 = vunpack.i.h.bf16 %v3148_v33  ;;  %v3149_v42 = vunpack.i.l.bf16 %v3148_v33  ;;  %v1916_v41 = vsel %vm1901_vm8, %v1883_v30, %v3154_v40  ;;  %v1917_v37 = vsel %vm1901_vm8, %v1884_v31, %v3155_v44 }
 0x195   : > { %v3163_v49 = vpop.permute.xlu1 %3162 }
 0x196   : > { %v3165_v2 = vunpack.i.h.bf16 %v3163_v49  ;;  %v3164_v4 = vunpack.i.l.bf16 %v3163_v49  ;;  %v1932_v0 = vsel %vm1901_vm8, %v1899_v45, %v3149_v42  ;;  %v1933_v63 = vsel %vm1901_vm8, %v1900_v39, %v3150_v10 }
 0x197   : > { %v3158_v32 = vpop.permute.xlu0 %3157 }
 0x198   : > { %v1949_v52 = vsel %vm1934_vm9, %v1916_v41, %v3164_v4  ;;  %v1950_v61 = vsel %vm1934_vm9, %v1917_v37, %v3165_v2  ;;  %v3160_v21 = vunpack.i.h.bf16 %v3158_v32  ;;  %v3159_v24 = vunpack.i.l.bf16 %v3158_v32 }
 0x199   : > { %v2459_v1 = vpack.c.bf16 %v1950_v61, %v1949_v52 }
 0x19a   : > { %v1965_v38 = vsel %vm1934_vm9, %v1932_v0, %v3159_v24  ;;  %v1966_v55 = vsel %vm1934_vm9, %v1933_v63, %v3160_v21 }
 0x19b   : > { %v2456_v6 = vpack.c.bf16 %v1966_v55, %v1965_v38 }
 0x19d   : > { %2458 = vmatprep.subr.msk.bf16.mxu0 %vm4941_vm11, %v2456_v6 }
 0x19e   : > { %2461 = vmatpush3.bf16.xpose.msk.msra.mxu0 %vm4941_vm11, %v2459_v1 }
 0x1a5   : > { %2413 = vmatmul.mubr.msk.f32.vlgmr.msra.gmra.mrb[0].mxu0 %vm1968_vm10, %v5171_v22 }
 0x278   : > { %v2134_v9 = vpop.f32.mrb[0].mxu0 }
 0x279   : > { %2139 = vst [vmem:[%s150_s20] sm:$0xff] %v2134_v9  ;;  %v2136_v34 = vpop.f32.mrb[1].mxu0 }
 0x27a   : > { %2140 = vst [vmem:[%s150_s20 + $0x8] sm:$0xff] %v2136_v34 }
 0x27b   : > { %3211 = shalt.err (!%p3208_p5)
}
 0x27c   : > { %s3212_s4 = scalar_lea.hbm %s5384_s27, 256  ;;  %s3216_s7 = scalar_lea.hbm %s5431_s2, 512 }
 0x27d   : > { %p3213_p6 = scmp.ne.s32.totalorder %s5384_s27, %s3212_s4  ;;  %p3217_p10 = scmp.lt.u32.totalorder %s5384_s27, %s5431_s2 }
 0x27e   : > { %p3218_p11 = scmp.lt.u32.totalorder %s3216_s7, %s3212_s4  ;;  %p3220_p13 = scmp.lt.u32.totalorder %s3212_s4, %s5384_s27 }
 0x27f   : > { %p3214_p7 = pnand %p3213_p6, %p3342_p4 }
 0x280   : > { %p3219_p12 = por %p3218_p11, %p3217_p10 }
 0x281   : > { %p3215_p9 = pneg %p3214_p7 }
 0x282   : > { %p3221_p0 = por %p3220_p13, %p3219_p12 }
 0x284   : > { %p3222_p1 = pnand %p3221_p0, %p3215_p9 }
 0x286   : > { %3225 = shalt.err (!%p3222_p1)
}
 0x287   : > { %2463 = dma.vmem_to_hbm [thread:$0]  (%p3342_p4), %s5379_s23, 256, %s5384_s27, %s2142_s28  }
 0x288 PF: > { %p2469_p2 = scmp.ge.s32.totalorder %s3276_s14, 2  ;;  %s2170_s16 = sand.u32 1, %s3256_s9  }
 0x289   : > { %s2171_s18 = scalar_lea.sflag [#allocation3], %s2170_s16 }
 0x28a   : > { %p2466_p3 = pnand %p2469_p2, %p3349_p8 }
 0x28c   : > { %3251 = dma.done.wait (!%p2466_p3), %s2171_s18, 256  }
 0x28d   : > { %3253 = vsyncadd (!%p2466_p3), %s2171_s18, 4294967040  ;;  %s15_s14 = sadd.s32 1, %s3276_s14   ;;  %s5713_s9 = smov %s3260_s10 }
 0x28e   : > { %p12_p5 = scmp.ge.s32.totalorder %s15_s14, 4   ;;  %s5714_s10 = smov %s3264_s11 }
 0x28f   : > { %s5715_s11 = smov %s3355_s22  ;;  %s5716_s12 = smov %s3272_s13 }
 0x290   : > { %s5717_s13 = smov %s5719_s17  ;;  %14 = sbr.rel (!%p12_p5) target bundleno = 4 (0x4), region = 66 }
 0x297   :  { %2176 = vsyncpa [#allocation3], 1 }
 0x298   :  { %2178 = vsyncpa [#allocation3 + $0x1], 1 }

</bundles_post_ra>
